<compile_context>
chip_gen: v7x
topology: tpu7x:2x2x1
jax: 0.10.0
libtpu: 0.0.40
codegen_flags: <defaults>
</compile_context>

<pallas_src>
import functools

import jax
import jax.numpy as jnp
from jax.experimental import pallas as pl
from jax.experimental.pallas import tpu as pltpu


def _global_calibration_kernel(masks_ref, x1_ref, x2_ref, w1_ref, b1_ref, w2_ref, b2_ref,
                               w3_ref, b3_ref, o1_ref, o2_ref, *, W):
    f32 = jnp.float32
    Nb, C, P = x1_ref.shape          # P == H * W (lane axis)
    D = w1_ref.shape[0]              # hidden channels of the embed convs

    x1 = x1_ref[...].astype(f32)     # (Nb, C, P)
    x2 = x2_ref[...].astype(f32)

    # ---- ChannelPool on both inputs.  The 1/C of the mean is folded into w1 (host side),
    #      so the kernel only needs [max_c(x1), sum_c(x1), max_c(x2), sum_c(x2)].
    pooled = (jnp.max(x1, axis=1, keepdims=True),
              jnp.sum(x1, axis=1, keepdims=True),
              jnp.max(x2, axis=1, keepdims=True),
              jnp.sum(x2, axis=1, keepdims=True))                  # each (Nb, 1, P)

    # ---- Conv2d(4, D, 1): weighted sum of the pooled maps (VPU broadcast MACs).
    w1 = w1_ref[...].astype(f32)                                   # (D, 4)  out on sublanes
    h1 = b1_ref[...].astype(f32).reshape(1, D, 1)
    for i in range(w1_ref.shape[1]):
        h1 = h1 + w1[:, i:i + 1].reshape(1, D, 1) * pooled[i]
    # h1: (Nb, D, P)

    # ---- Conv2d(D, D, 3, padding=1): 9 lane-rolled taps (XLU) + precomputed boundary
    #      masks, D*D broadcast MACs each.  Center tap needs no mask (always valid).
    w2 = w2_ref[...].astype(f32)                                   # (D, 9*D)
    acc = b2_ref[...].astype(f32).reshape(1, D, 1)
    t = 0
    for dh in (-1, 0, 1):
        for dw in (-1, 0, 1):
            s = dh * W + dw
            rolled = h1 if s == 0 else pltpu.roll(h1, shift=(-s) % P, axis=2)
            if dh == 0 and dw == 0:
                tap = rolled                                       # interior tap: all valid
            else:
                mask = masks_ref[t:t + 1, :].reshape(1, 1, P)      # (1, 1, P), zero outside
                tap = rolled * mask
            for ci in range(D):
                j = t * D + ci
                col = w2[:, j:j + 1].reshape(1, D, 1)              # weights over out-channels
                acc = acc + col * tap[:, ci:ci + 1, :]
            t += 1

    # ---- ReLU
    h2 = jnp.maximum(acc, 0.0)                                     # (Nb, D, P)

    # ---- Conv2d(D, 2, 1) + Sigmoid (exp + approx reciprocal both on the EUP slot).
    w3 = w3_ref[...].astype(f32)                                   # (2, D)
    z = b3_ref[...].astype(f32).reshape(1, 2, 1)
    for d in range(D):
        z = z + w3[:, d:d + 1].reshape(1, 2, 1) * h2[:, d:d + 1, :]
    g = pl.reciprocal(1.0 + jnp.exp(-z), approx=True)              # (Nb, 2, P)

    # ---- split gates and rescale (sublane broadcast over C); lane-dense stores.
    o1_ref[...] = (x1 * g[:, 0:1, :]).astype(o1_ref.dtype)
    o2_ref[...] = (x2 * g[:, 1:2, :]).astype(o2_ref.dtype)


def global_calibration(x1, x2, params, *, block_n=8):
    """x1, x2: (N, C, H, W) arrays (PyTorch NCHW layout). Returns (x1_out, x2_out)."""
    N, C, H, W = x1.shape
    P = H * W
    w1, b1, w2, b2, w3, b3 = params
    D = w1.shape[1]

    # Lane-major repack: free reshapes for the big streams, tiny transposes for weights.
    x1f = x1.reshape(N, C, P)
    x2f = x2.reshape(N, C, P)
    w1_t = w1.T                                                    # (D, 4)      (out, in)
    # Fold the ChannelPool 1/C mean scale into the two "mean" input columns (1 and 3)
    # so the kernel only needs channel sums.  Weight-only fold: 16 elements, free.
    w1_t = w1_t * jnp.array([1.0, 1.0 / C, 1.0, 1.0 / C], w1_t.dtype)[None, :]
    w2_t = jnp.transpose(w2, (3, 0, 1, 2)).reshape(D, 9 * D)       # (out, tap*in), one tile
    w3_t = w3.T                                                    # (2, D)      (out, in)
    b1c = b1.reshape(D, 1)
    b2c = b2.reshape(D, 1)
    b3c = b3.reshape(2, 1)

    # Precomputed 3x3 boundary masks, tap-major (dh, dw).  Grid-invariant, so the (9, P)
    # tile is DMA'd once; removes per-step iota / integer div / compares from the kernel.
    pos = jnp.arange(P, dtype=jnp.int32)
    h_idx = pos // W
    w_idx = pos - h_idx * W
    mask_rows = []
    for dh in (-1, 0, 1):
        for dw in (-1, 0, 1):
            ok = ((h_idx + dh >= 0) & (h_idx + dh < H) &
                  (w_idx + dw >= 0) & (w_idx + dw < W))
            mask_rows.append(ok.astype(jnp.float32))
    masks = jnp.stack(mask_rows, axis=0)                           # (9, P)

    # Batch multiple images per grid step to amortize per-step overhead.
    nb = min(block_n, N)
    while N % nb:
        nb -= 1

    # NOTE: at production H*W, tile the pixel axis into row strips (with a 1-row halo for
    # the 3x3 conv) and size strips to the scoped VMEM budget (v7x 32 MiB, v5e 16 MiB),
    # optionally raising pltpu.CompilerParams(vmem_limit_bytes=...).  For these shapes a
    # whole image is a few KB per block, so no strip tiling is needed.
    batch_map = lambda n: (n, 0, 0)
    whole = lambda n: (0, 0)

    kernel = functools.partial(_global_calibration_kernel, W=W)
    o1f, o2f = pl.pallas_call(
        kernel,
        out_shape=(jax.ShapeDtypeStruct((N, C, P), x1.dtype),
                   jax.ShapeDtypeStruct((N, C, P), x2.dtype)),
        grid_spec=pltpu.PrefetchScalarGridSpec(
            num_scalar_prefetch=0,
            grid=(N // nb,),
            in_specs=[
                pl.BlockSpec((9, P), whole),             # 3x3 boundary masks
                pl.BlockSpec((nb, C, P), batch_map),     # x1
                pl.BlockSpec((nb, C, P), batch_map),     # x2
                pl.BlockSpec((D, 4), whole),             # w1 (out, in), mean scale folded
                pl.BlockSpec((D, 1), whole),             # b1
                pl.BlockSpec((D, 9 * D), whole),         # w2 packed (out, tap*in)
                pl.BlockSpec((D, 1), whole),             # b2
                pl.BlockSpec((2, D), whole),             # w3 (out, in)
                pl.BlockSpec((2, 1), whole),             # b3
            ],
            out_specs=[
                pl.BlockSpec((nb, C, P), batch_map),
                pl.BlockSpec((nb, C, P), batch_map),
            ],
        ),
        # Independent batch blocks -> parallel axis (v7x: shard across both TensorCores).
        compiler_params=pltpu.CompilerParams(dimension_semantics=("parallel",)),
    )(masks, x1f, x2f, w1_t, b1c, w2_t, b2c, w3_t, b3c)
    return o1f.reshape(N, C, H, W), o2f.reshape(N, C, H, W)


def ref_forward(x1, x2, params):
    """Pure-JAX NCHW reference mirroring the PyTorch module semantics."""
    w1, b1, w2, b2, w3, b3 = params
    N, C, H, W = x1.shape
    D = w1.shape[1]

    def pool(x):  # (N,C,H,W) -> (N,2,H,W): [max_c, mean_c]
        return jnp.stack([jnp.max(x, axis=1), jnp.mean(x, axis=1)], axis=1)

    hidden = jnp.concatenate([pool(x1), pool(x2)], axis=1)                       # (N,4,H,W)
    h1 = jnp.einsum('nchw,cd->ndhw', hidden, w1) + b1[None, :, None, None]       # 1x1 conv
    h1p = jnp.pad(h1, ((0, 0), (0, 0), (1, 1), (1, 1)))
    acc = jnp.zeros((N, D, H, W), jnp.float32) + b2[None, :, None, None]
    for kh in range(3):
        for kw in range(3):
            acc = acc + jnp.einsum('nchw,cd->ndhw',
                                   h1p[:, :, kh:kh + H, kw:kw + W], w2[kh, kw])
    h2 = jnp.maximum(acc, 0.0)
    g = jax.nn.sigmoid(jnp.einsum('ndhw,de->nehw', h2, w3) + b3[None, :, None, None])
    return x1 * g[:, 0:1], x2 * g[:, 1:2]


if __name__ == "__main__":
    N, H, W = 2, 16, 16
    dim, reduction = 4, 1
    C, D = dim, dim // reduction

    key = jax.random.PRNGKey(0)
    ks = jax.random.split(key, 8)
    x1 = jax.random.normal(ks[0], (N, C, H, W), jnp.float32)
    x2 = jax.random.normal(ks[1], (N, C, H, W), jnp.float32)

    # Deterministic synthetic parameters (nn.Conv2d (out,in,kh,kw) mapped to (kh,kw,in,out)).
    w1 = jax.random.normal(ks[2], (4, D), jnp.float32) * 0.2        # Conv2d(4, D, 1)
    b1 = jax.random.normal(ks[3], (D,), jnp.float32) * 0.1
    w2 = jax.random.normal(ks[4], (3, 3, D, D), jnp.float32) * 0.2  # Conv2d(D, D, 3, pad=1)
    b2 = jax.random.normal(ks[5], (D,), jnp.float32) * 0.1
    w3 = jax.random.normal(ks[6], (D, 2), jnp.float32) * 0.2        # Conv2d(D, 2, 1)
    b3 = jax.random.normal(ks[7], (2,), jnp.float32) * 0.1
    params = (w1, b1, w2, b2, w3, b3)

    o1, o2 = global_calibration(x1, x2, params)
    jax.block_until_ready((o1, o2))

    r1, r2 = ref_forward(x1, x2, params)
    # Tolerance covers the approximate EUP reciprocal used inside the sigmoid.
    assert jnp.allclose(o1, r1, atol=1e-2, rtol=1e-2), float(jnp.max(jnp.abs(o1 - r1)))
    assert jnp.allclose(o2, r2, atol=1e-2, rtol=1e-2), float(jnp.max(jnp.abs(o2 - r2)))
    print("KERNEL_OK")
</pallas_src>

<mosaic_0001>
module attributes {stable_mosaic.version = 11 : i64} {
  func.func @_global_calibration_kernel(%arg0: i32, %arg1: memref<9x256xf32, #tpu.memory_space<vmem>>, %arg2: memref<2x4x256xf32, #tpu.memory_space<vmem>>, %arg3: memref<2x4x256xf32, #tpu.memory_space<vmem>>, %arg4: memref<4x4xf32, #tpu.memory_space<vmem>>, %arg5: memref<4x1xf32, #tpu.memory_space<vmem>>, %arg6: memref<4x36xf32, #tpu.memory_space<vmem>>, %arg7: memref<4x1xf32, #tpu.memory_space<vmem>>, %arg8: memref<2x4xf32, #tpu.memory_space<vmem>>, %arg9: memref<2x1xf32, #tpu.memory_space<vmem>>, %arg10: memref<2x4x256xf32, #tpu.memory_space<vmem>>, %arg11: memref<2x4x256xf32, #tpu.memory_space<vmem>>) attributes {dimension_semantics = [#tpu.dimension_semantics<parallel>], iteration_bounds = array<i64: 1>, scalar_prefetch = 0 : i64, scratch_operands = 0 : i64, tpu.core_type = #tpu.core_type<tc>, window_params = [{pipeline_mode = #tpu.pipeline_mode<synchronous>, transform_indices = @transform_0, window_bounds = array<i64: 9, 256>}, {transform_indices = @transform_1, window_bounds = array<i64: 2, 4, 256>}, {transform_indices = @transform_2, window_bounds = array<i64: 2, 4, 256>}, {pipeline_mode = #tpu.pipeline_mode<synchronous>, transform_indices = @transform_3, window_bounds = array<i64: 4, 4>}, {pipeline_mode = #tpu.pipeline_mode<synchronous>, transform_indices = @transform_4, window_bounds = array<i64: 4, 1>}, {pipeline_mode = #tpu.pipeline_mode<synchronous>, transform_indices = @transform_5, window_bounds = array<i64: 4, 36>}, {pipeline_mode = #tpu.pipeline_mode<synchronous>, transform_indices = @transform_6, window_bounds = array<i64: 4, 1>}, {pipeline_mode = #tpu.pipeline_mode<synchronous>, transform_indices = @transform_7, window_bounds = array<i64: 2, 4>}, {pipeline_mode = #tpu.pipeline_mode<synchronous>, transform_indices = @transform_8, window_bounds = array<i64: 2, 1>}, {transform_indices = @transform_9, window_bounds = array<i64: 2, 4, 256>}, {transform_indices = @transform_10, window_bounds = array<i64: 2, 4, 256>}]} {
    %c0 = arith.constant 0 : index
    %c0_0 = arith.constant 0 : index
    %c0_1 = arith.constant 0 : index
    %0 = vector.load %arg2[%c0, %c0_0, %c0_1] : memref<2x4x256xf32, #tpu.memory_space<vmem>>, vector<2x4x256xf32>
    %c0_2 = arith.constant 0 : index
    %c0_3 = arith.constant 0 : index
    %c0_4 = arith.constant 0 : index
    %1 = vector.load %arg3[%c0_2, %c0_3, %c0_4] : memref<2x4x256xf32, #tpu.memory_space<vmem>>, vector<2x4x256xf32>
    %cst = arith.constant dense<0xFF800000> : vector<2x256xf32>
    %2 = vector.multi_reduction <maximumf>, %0, %cst [1] : vector<2x4x256xf32> to vector<2x256xf32>
    %3 = vector.shape_cast %2 : vector<2x256xf32> to vector<2x1x256xf32>
    %cst_5 = arith.constant dense<0.000000e+00> : vector<2x256xf32>
    %4 = vector.multi_reduction <add>, %0, %cst_5 [1] : vector<2x4x256xf32> to vector<2x256xf32>
    %5 = vector.shape_cast %4 : vector<2x256xf32> to vector<2x1x256xf32>
    %cst_6 = arith.constant dense<0xFF800000> : vector<2x256xf32>
    %6 = vector.multi_reduction <maximumf>, %1, %cst_6 [1] : vector<2x4x256xf32> to vector<2x256xf32>
    %7 = vector.shape_cast %6 : vector<2x256xf32> to vector<2x1x256xf32>
    %cst_7 = arith.constant dense<0.000000e+00> : vector<2x256xf32>
    %8 = vector.multi_reduction <add>, %1, %cst_7 [1] : vector<2x4x256xf32> to vector<2x256xf32>
    %9 = vector.shape_cast %8 : vector<2x256xf32> to vector<2x1x256xf32>
    %c0_8 = arith.constant 0 : index
    %c0_9 = arith.constant 0 : index
    %10 = vector.load %arg4[%c0_8, %c0_9] : memref<4x4xf32, #tpu.memory_space<vmem>>, vector<4x4xf32>
    %c0_10 = arith.constant 0 : index
    %c0_11 = arith.constant 0 : index
    %11 = vector.load %arg5[%c0_10, %c0_11] : memref<4x1xf32, #tpu.memory_space<vmem>>, vector<4x1xf32>
    %12 = vector.shape_cast %11 : vector<4x1xf32> to vector<1x4x1xf32>
    %13 = vector.extract_strided_slice %10 {offsets = [0, 0], sizes = [4, 1], strides = [1, 1]} : vector<4x4xf32> to vector<4x1xf32>
    %14 = vector.shape_cast %13 : vector<4x1xf32> to vector<1x4x1xf32>
    %15 = vector.broadcast %14 : vector<1x4x1xf32> to vector<2x4x256xf32>
    %16 = vector.broadcast %3 : vector<2x1x256xf32> to vector<2x4x256xf32>
    %17 = arith.mulf %15, %16 : vector<2x4x256xf32>
    %18 = vector.broadcast %12 : vector<1x4x1xf32> to vector<2x4x256xf32>
    %19 = arith.addf %18, %17 : vector<2x4x256xf32>
    %20 = vector.extract_strided_slice %10 {offsets = [0, 1], sizes = [4, 1], strides = [1, 1]} : vector<4x4xf32> to vector<4x1xf32>
    %21 = vector.shape_cast %20 : vector<4x1xf32> to vector<1x4x1xf32>
    %22 = vector.broadcast %21 : vector<1x4x1xf32> to vector<2x4x256xf32>
    %23 = vector.broadcast %5 : vector<2x1x256xf32> to vector<2x4x256xf32>
    %24 = arith.mulf %22, %23 : vector<2x4x256xf32>
    %25 = arith.addf %19, %24 : vector<2x4x256xf32>
    %26 = vector.extract_strided_slice %10 {offsets = [0, 2], sizes = [4, 1], strides = [1, 1]} : vector<4x4xf32> to vector<4x1xf32>
    %27 = vector.shape_cast %26 : vector<4x1xf32> to vector<1x4x1xf32>
    %28 = vector.broadcast %27 : vector<1x4x1xf32> to vector<2x4x256xf32>
    %29 = vector.broadcast %7 : vector<2x1x256xf32> to vector<2x4x256xf32>
    %30 = arith.mulf %28, %29 : vector<2x4x256xf32>
    %31 = arith.addf %25, %30 : vector<2x4x256xf32>
    %32 = vector.extract_strided_slice %10 {offsets = [0, 3], sizes = [4, 1], strides = [1, 1]} : vector<4x4xf32> to vector<4x1xf32>
    %33 = vector.shape_cast %32 : vector<4x1xf32> to vector<1x4x1xf32>
    %34 = vector.broadcast %33 : vector<1x4x1xf32> to vector<2x4x256xf32>
    %35 = vector.broadcast %9 : vector<2x1x256xf32> to vector<2x4x256xf32>
    %36 = arith.mulf %34, %35 : vector<2x4x256xf32>
    %37 = arith.addf %31, %36 : vector<2x4x256xf32>
    %c0_12 = arith.constant 0 : index
    %c0_13 = arith.constant 0 : index
    %38 = vector.load %arg6[%c0_12, %c0_13] : memref<4x36xf32, #tpu.memory_space<vmem>>, vector<4x36xf32>
    %c0_14 = arith.constant 0 : index
    %c0_15 = arith.constant 0 : index
    %39 = vector.load %arg7[%c0_14, %c0_15] : memref<4x1xf32, #tpu.memory_space<vmem>>, vector<4x1xf32>
    %40 = vector.shape_cast %39 : vector<4x1xf32> to vector<1x4x1xf32>
    %c17_i32 = arith.constant 17 : i32
    %41 = tpu.dynamic_rotate %37 by %c17_i32 dim 2 : vector<2x4x256xf32>, i32 -> vector<2x4x256xf32>
    %c0_16 = arith.constant 0 : index
    %c0_17 = arith.constant 0 : index
    %42 = vector.load %arg1[%c0_16, %c0_17] : memref<9x256xf32, #tpu.memory_space<vmem>>, vector<1x256xf32>
    %43 = vector.shape_cast %42 : vector<1x256xf32> to vector<1x1x256xf32>
    %44 = vector.broadcast %43 : vector<1x1x256xf32> to vector<2x4x256xf32>
    %45 = arith.mulf %41, %44 : vector<2x4x256xf32>
    %46 = vector.extract_strided_slice %38 {offsets = [0, 0], sizes = [4, 1], strides = [1, 1]} : vector<4x36xf32> to vector<4x1xf32>
    %47 = vector.shape_cast %46 : vector<4x1xf32> to vector<1x4x1xf32>
    %48 = vector.extract_strided_slice %45 {offsets = [0, 0, 0], sizes = [2, 1, 256], strides = [1, 1, 1]} : vector<2x4x256xf32> to vector<2x1x256xf32>
    %49 = vector.broadcast %47 : vector<1x4x1xf32> to vector<2x4x256xf32>
    %50 = vector.broadcast %48 : vector<2x1x256xf32> to vector<2x4x256xf32>
    %51 = arith.mulf %49, %50 : vector<2x4x256xf32>
    %52 = vector.broadcast %40 : vector<1x4x1xf32> to vector<2x4x256xf32>
    %53 = arith.addf %52, %51 : vector<2x4x256xf32>
    %54 = vector.extract_strided_slice %38 {offsets = [0, 1], sizes = [4, 1], strides = [1, 1]} : vector<4x36xf32> to vector<4x1xf32>
    %55 = vector.shape_cast %54 : vector<4x1xf32> to vector<1x4x1xf32>
    %56 = vector.extract_strided_slice %45 {offsets = [0, 1, 0], sizes = [2, 1, 256], strides = [1, 1, 1]} : vector<2x4x256xf32> to vector<2x1x256xf32>
    %57 = vector.broadcast %55 : vector<1x4x1xf32> to vector<2x4x256xf32>
    %58 = vector.broadcast %56 : vector<2x1x256xf32> to vector<2x4x256xf32>
    %59 = arith.mulf %57, %58 : vector<2x4x256xf32>
    %60 = arith.addf %53, %59 : vector<2x4x256xf32>
    %61 = vector.extract_strided_slice %38 {offsets = [0, 2], sizes = [4, 1], strides = [1, 1]} : vector<4x36xf32> to vector<4x1xf32>
    %62 = vector.shape_cast %61 : vector<4x1xf32> to vector<1x4x1xf32>
    %63 = vector.extract_strided_slice %45 {offsets = [0, 2, 0], sizes = [2, 1, 256], strides = [1, 1, 1]} : vector<2x4x256xf32> to vector<2x1x256xf32>
    %64 = vector.broadcast %62 : vector<1x4x1xf32> to vector<2x4x256xf32>
    %65 = vector.broadcast %63 : vector<2x1x256xf32> to vector<2x4x256xf32>
    %66 = arith.mulf %64, %65 : vector<2x4x256xf32>
    %67 = arith.addf %60, %66 : vector<2x4x256xf32>
    %68 = vector.extract_strided_slice %38 {offsets = [0, 3], sizes = [4, 1], strides = [1, 1]} : vector<4x36xf32> to vector<4x1xf32>
    %69 = vector.shape_cast %68 : vector<4x1xf32> to vector<1x4x1xf32>
    %70 = vector.extract_strided_slice %45 {offsets = [0, 3, 0], sizes = [2, 1, 256], strides = [1, 1, 1]} : vector<2x4x256xf32> to vector<2x1x256xf32>
    %71 = vector.broadcast %69 : vector<1x4x1xf32> to vector<2x4x256xf32>
    %72 = vector.broadcast %70 : vector<2x1x256xf32> to vector<2x4x256xf32>
    %73 = arith.mulf %71, %72 : vector<2x4x256xf32>
    %74 = arith.addf %67, %73 : vector<2x4x256xf32>
    %c16_i32 = arith.constant 16 : i32
    %75 = tpu.dynamic_rotate %37 by %c16_i32 dim 2 : vector<2x4x256xf32>, i32 -> vector<2x4x256xf32>
    %c1 = arith.constant 1 : index
    %c0_18 = arith.constant 0 : index
    %76 = vector.load %arg1[%c1, %c0_18] : memref<9x256xf32, #tpu.memory_space<vmem>>, vector<1x256xf32>
    %77 = vector.shape_cast %76 : vector<1x256xf32> to vector<1x1x256xf32>
    %78 = vector.broadcast %77 : vector<1x1x256xf32> to vector<2x4x256xf32>
    %79 = arith.mulf %75, %78 : vector<2x4x256xf32>
    %80 = vector.extract_strided_slice %38 {offsets = [0, 4], sizes = [4, 1], strides = [1, 1]} : vector<4x36xf32> to vector<4x1xf32>
    %81 = vector.shape_cast %80 : vector<4x1xf32> to vector<1x4x1xf32>
    %82 = vector.extract_strided_slice %79 {offsets = [0, 0, 0], sizes = [2, 1, 256], strides = [1, 1, 1]} : vector<2x4x256xf32> to vector<2x1x256xf32>
    %83 = vector.broadcast %81 : vector<1x4x1xf32> to vector<2x4x256xf32>
    %84 = vector.broadcast %82 : vector<2x1x256xf32> to vector<2x4x256xf32>
    %85 = arith.mulf %83, %84 : vector<2x4x256xf32>
    %86 = arith.addf %74, %85 : vector<2x4x256xf32>
    %87 = vector.extract_strided_slice %38 {offsets = [0, 5], sizes = [4, 1], strides = [1, 1]} : vector<4x36xf32> to vector<4x1xf32>
    %88 = vector.shape_cast %87 : vector<4x1xf32> to vector<1x4x1xf32>
    %89 = vector.extract_strided_slice %79 {offsets = [0, 1, 0], sizes = [2, 1, 256], strides = [1, 1, 1]} : vector<2x4x256xf32> to vector<2x1x256xf32>
    %90 = vector.broadcast %88 : vector<1x4x1xf32> to vector<2x4x256xf32>
    %91 = vector.broadcast %89 : vector<2x1x256xf32> to vector<2x4x256xf32>
    %92 = arith.mulf %90, %91 : vector<2x4x256xf32>
    %93 = arith.addf %86, %92 : vector<2x4x256xf32>
    %94 = vector.extract_strided_slice %38 {offsets = [0, 6], sizes = [4, 1], strides = [1, 1]} : vector<4x36xf32> to vector<4x1xf32>
    %95 = vector.shape_cast %94 : vector<4x1xf32> to vector<1x4x1xf32>
    %96 = vector.extract_strided_slice %79 {offsets = [0, 2, 0], sizes = [2, 1, 256], strides = [1, 1, 1]} : vector<2x4x256xf32> to vector<2x1x256xf32>
    %97 = vector.broadcast %95 : vector<1x4x1xf32> to vector<2x4x256xf32>
    %98 = vector.broadcast %96 : vector<2x1x256xf32> to vector<2x4x256xf32>
    %99 = arith.mulf %97, %98 : vector<2x4x256xf32>
    %100 = arith.addf %93, %99 : vector<2x4x256xf32>
    %101 = vector.extract_strided_slice %38 {offsets = [0, 7], sizes = [4, 1], strides = [1, 1]} : vector<4x36xf32> to vector<4x1xf32>
    %102 = vector.shape_cast %101 : vector<4x1xf32> to vector<1x4x1xf32>
    %103 = vector.extract_strided_slice %79 {offsets = [0, 3, 0], sizes = [2, 1, 256], strides = [1, 1, 1]} : vector<2x4x256xf32> to vector<2x1x256xf32>
    %104 = vector.broadcast %102 : vector<1x4x1xf32> to vector<2x4x256xf32>
    %105 = vector.broadcast %103 : vector<2x1x256xf32> to vector<2x4x256xf32>
    %106 = arith.mulf %104, %105 : vector<2x4x256xf32>
    %107 = arith.addf %100, %106 : vector<2x4x256xf32>
    %c15_i32 = arith.constant 15 : i32
    %108 = tpu.dynamic_rotate %37 by %c15_i32 dim 2 : vector<2x4x256xf32>, i32 -> vector<2x4x256xf32>
    %c2 = arith.constant 2 : index
    %c0_19 = arith.constant 0 : index
    %109 = vector.load %arg1[%c2, %c0_19] : memref<9x256xf32, #tpu.memory_space<vmem>>, vector<1x256xf32>
    %110 = vector.shape_cast %109 : vector<1x256xf32> to vector<1x1x256xf32>
    %111 = vector.broadcast %110 : vector<1x1x256xf32> to vector<2x4x256xf32>
    %112 = arith.mulf %108, %111 : vector<2x4x256xf32>
    %113 = vector.extract_strided_slice %38 {offsets = [0, 8], sizes = [4, 1], strides = [1, 1]} : vector<4x36xf32> to vector<4x1xf32>
    %114 = vector.shape_cast %113 : vector<4x1xf32> to vector<1x4x1xf32>
    %115 = vector.extract_strided_slice %112 {offsets = [0, 0, 0], sizes = [2, 1, 256], strides = [1, 1, 1]} : vector<2x4x256xf32> to vector<2x1x256xf32>
    %116 = vector.broadcast %114 : vector<1x4x1xf32> to vector<2x4x256xf32>
    %117 = vector.broadcast %115 : vector<2x1x256xf32> to vector<2x4x256xf32>
    %118 = arith.mulf %116, %117 : vector<2x4x256xf32>
    %119 = arith.addf %107, %118 : vector<2x4x256xf32>
    %120 = vector.extract_strided_slice %38 {offsets = [0, 9], sizes = [4, 1], strides = [1, 1]} : vector<4x36xf32> to vector<4x1xf32>
    %121 = vector.shape_cast %120 : vector<4x1xf32> to vector<1x4x1xf32>
    %122 = vector.extract_strided_slice %112 {offsets = [0, 1, 0], sizes = [2, 1, 256], strides = [1, 1, 1]} : vector<2x4x256xf32> to vector<2x1x256xf32>
    %123 = vector.broadcast %121 : vector<1x4x1xf32> to vector<2x4x256xf32>
    %124 = vector.broadcast %122 : vector<2x1x256xf32> to vector<2x4x256xf32>
    %125 = arith.mulf %123, %124 : vector<2x4x256xf32>
    %126 = arith.addf %119, %125 : vector<2x4x256xf32>
    %127 = vector.extract_strided_slice %38 {offsets = [0, 10], sizes = [4, 1], strides = [1, 1]} : vector<4x36xf32> to vector<4x1xf32>
    %128 = vector.shape_cast %127 : vector<4x1xf32> to vector<1x4x1xf32>
    %129 = vector.extract_strided_slice %112 {offsets = [0, 2, 0], sizes = [2, 1, 256], strides = [1, 1, 1]} : vector<2x4x256xf32> to vector<2x1x256xf32>
    %130 = vector.broadcast %128 : vector<1x4x1xf32> to vector<2x4x256xf32>
    %131 = vector.broadcast %129 : vector<2x1x256xf32> to vector<2x4x256xf32>
    %132 = arith.mulf %130, %131 : vector<2x4x256xf32>
    %133 = arith.addf %126, %132 : vector<2x4x256xf32>
    %134 = vector.extract_strided_slice %38 {offsets = [0, 11], sizes = [4, 1], strides = [1, 1]} : vector<4x36xf32> to vector<4x1xf32>
    %135 = vector.shape_cast %134 : vector<4x1xf32> to vector<1x4x1xf32>
    %136 = vector.extract_strided_slice %112 {offsets = [0, 3, 0], sizes = [2, 1, 256], strides = [1, 1, 1]} : vector<2x4x256xf32> to vector<2x1x256xf32>
    %137 = vector.broadcast %135 : vector<1x4x1xf32> to vector<2x4x256xf32>
    %138 = vector.broadcast %136 : vector<2x1x256xf32> to vector<2x4x256xf32>
    %139 = arith.mulf %137, %138 : vector<2x4x256xf32>
    %140 = arith.addf %133, %139 : vector<2x4x256xf32>
    %c1_i32 = arith.constant 1 : i32
    %141 = tpu.dynamic_rotate %37 by %c1_i32 dim 2 : vector<2x4x256xf32>, i32 -> vector<2x4x256xf32>
    %c3 = arith.constant 3 : index
    %c0_20 = arith.constant 0 : index
    %142 = vector.load %arg1[%c3, %c0_20] : memref<9x256xf32, #tpu.memory_space<vmem>>, vector<1x256xf32>
    %143 = vector.shape_cast %142 : vector<1x256xf32> to vector<1x1x256xf32>
    %144 = vector.broadcast %143 : vector<1x1x256xf32> to vector<2x4x256xf32>
    %145 = arith.mulf %141, %144 : vector<2x4x256xf32>
    %146 = vector.extract_strided_slice %38 {offsets = [0, 12], sizes = [4, 1], strides = [1, 1]} : vector<4x36xf32> to vector<4x1xf32>
    %147 = vector.shape_cast %146 : vector<4x1xf32> to vector<1x4x1xf32>
    %148 = vector.extract_strided_slice %145 {offsets = [0, 0, 0], sizes = [2, 1, 256], strides = [1, 1, 1]} : vector<2x4x256xf32> to vector<2x1x256xf32>
    %149 = vector.broadcast %147 : vector<1x4x1xf32> to vector<2x4x256xf32>
    %150 = vector.broadcast %148 : vector<2x1x256xf32> to vector<2x4x256xf32>
    %151 = arith.mulf %149, %150 : vector<2x4x256xf32>
    %152 = arith.addf %140, %151 : vector<2x4x256xf32>
    %153 = vector.extract_strided_slice %38 {offsets = [0, 13], sizes = [4, 1], strides = [1, 1]} : vector<4x36xf32> to vector<4x1xf32>
    %154 = vector.shape_cast %153 : vector<4x1xf32> to vector<1x4x1xf32>
    %155 = vector.extract_strided_slice %145 {offsets = [0, 1, 0], sizes = [2, 1, 256], strides = [1, 1, 1]} : vector<2x4x256xf32> to vector<2x1x256xf32>
    %156 = vector.broadcast %154 : vector<1x4x1xf32> to vector<2x4x256xf32>
    %157 = vector.broadcast %155 : vector<2x1x256xf32> to vector<2x4x256xf32>
    %158 = arith.mulf %156, %157 : vector<2x4x256xf32>
    %159 = arith.addf %152, %158 : vector<2x4x256xf32>
    %160 = vector.extract_strided_slice %38 {offsets = [0, 14], sizes = [4, 1], strides = [1, 1]} : vector<4x36xf32> to vector<4x1xf32>
    %161 = vector.shape_cast %160 : vector<4x1xf32> to vector<1x4x1xf32>
    %162 = vector.extract_strided_slice %145 {offsets = [0, 2, 0], sizes = [2, 1, 256], strides = [1, 1, 1]} : vector<2x4x256xf32> to vector<2x1x256xf32>
    %163 = vector.broadcast %161 : vector<1x4x1xf32> to vector<2x4x256xf32>
    %164 = vector.broadcast %162 : vector<2x1x256xf32> to vector<2x4x256xf32>
    %165 = arith.mulf %163, %164 : vector<2x4x256xf32>
    %166 = arith.addf %159, %165 : vector<2x4x256xf32>
    %167 = vector.extract_strided_slice %38 {offsets = [0, 15], sizes = [4, 1], strides = [1, 1]} : vector<4x36xf32> to vector<4x1xf32>
    %168 = vector.shape_cast %167 : vector<4x1xf32> to vector<1x4x1xf32>
    %169 = vector.extract_strided_slice %145 {offsets = [0, 3, 0], sizes = [2, 1, 256], strides = [1, 1, 1]} : vector<2x4x256xf32> to vector<2x1x256xf32>
    %170 = vector.broadcast %168 : vector<1x4x1xf32> to vector<2x4x256xf32>
    %171 = vector.broadcast %169 : vector<2x1x256xf32> to vector<2x4x256xf32>
    %172 = arith.mulf %170, %171 : vector<2x4x256xf32>
    %173 = arith.addf %166, %172 : vector<2x4x256xf32>
    %174 = vector.extract_strided_slice %38 {offsets = [0, 16], sizes = [4, 1], strides = [1, 1]} : vector<4x36xf32> to vector<4x1xf32>
    %175 = vector.shape_cast %174 : vector<4x1xf32> to vector<1x4x1xf32>
    %176 = vector.extract_strided_slice %37 {offsets = [0, 0, 0], sizes = [2, 1, 256], strides = [1, 1, 1]} : vector<2x4x256xf32> to vector<2x1x256xf32>
    %177 = vector.broadcast %175 : vector<1x4x1xf32> to vector<2x4x256xf32>
    %178 = vector.broadcast %176 : vector<2x1x256xf32> to vector<2x4x256xf32>
    %179 = arith.mulf %177, %178 : vector<2x4x256xf32>
    %180 = arith.addf %173, %179 : vector<2x4x256xf32>
    %181 = vector.extract_strided_slice %38 {offsets = [0, 17], sizes = [4, 1], strides = [1, 1]} : vector<4x36xf32> to vector<4x1xf32>
    %182 = vector.shape_cast %181 : vector<4x1xf32> to vector<1x4x1xf32>
    %183 = vector.extract_strided_slice %37 {offsets = [0, 1, 0], sizes = [2, 1, 256], strides = [1, 1, 1]} : vector<2x4x256xf32> to vector<2x1x256xf32>
    %184 = vector.broadcast %182 : vector<1x4x1xf32> to vector<2x4x256xf32>
    %185 = vector.broadcast %183 : vector<2x1x256xf32> to vector<2x4x256xf32>
    %186 = arith.mulf %184, %185 : vector<2x4x256xf32>
    %187 = arith.addf %180, %186 : vector<2x4x256xf32>
    %188 = vector.extract_strided_slice %38 {offsets = [0, 18], sizes = [4, 1], strides = [1, 1]} : vector<4x36xf32> to vector<4x1xf32>
    %189 = vector.shape_cast %188 : vector<4x1xf32> to vector<1x4x1xf32>
    %190 = vector.extract_strided_slice %37 {offsets = [0, 2, 0], sizes = [2, 1, 256], strides = [1, 1, 1]} : vector<2x4x256xf32> to vector<2x1x256xf32>
    %191 = vector.broadcast %189 : vector<1x4x1xf32> to vector<2x4x256xf32>
    %192 = vector.broadcast %190 : vector<2x1x256xf32> to vector<2x4x256xf32>
    %193 = arith.mulf %191, %192 : vector<2x4x256xf32>
    %194 = arith.addf %187, %193 : vector<2x4x256xf32>
    %195 = vector.extract_strided_slice %38 {offsets = [0, 19], sizes = [4, 1], strides = [1, 1]} : vector<4x36xf32> to vector<4x1xf32>
    %196 = vector.shape_cast %195 : vector<4x1xf32> to vector<1x4x1xf32>
    %197 = vector.extract_strided_slice %37 {offsets = [0, 3, 0], sizes = [2, 1, 256], strides = [1, 1, 1]} : vector<2x4x256xf32> to vector<2x1x256xf32>
    %198 = vector.broadcast %196 : vector<1x4x1xf32> to vector<2x4x256xf32>
    %199 = vector.broadcast %197 : vector<2x1x256xf32> to vector<2x4x256xf32>
    %200 = arith.mulf %198, %199 : vector<2x4x256xf32>
    %201 = arith.addf %194, %200 : vector<2x4x256xf32>
    %c255_i32 = arith.constant 255 : i32
    %202 = tpu.dynamic_rotate %37 by %c255_i32 dim 2 : vector<2x4x256xf32>, i32 -> vector<2x4x256xf32>
    %c5 = arith.constant 5 : index
    %c0_21 = arith.constant 0 : index
    %203 = vector.load %arg1[%c5, %c0_21] : memref<9x256xf32, #tpu.memory_space<vmem>>, vector<1x256xf32>
    %204 = vector.shape_cast %203 : vector<1x256xf32> to vector<1x1x256xf32>
    %205 = vector.broadcast %204 : vector<1x1x256xf32> to vector<2x4x256xf32>
    %206 = arith.mulf %202, %205 : vector<2x4x256xf32>
    %207 = vector.extract_strided_slice %38 {offsets = [0, 20], sizes = [4, 1], strides = [1, 1]} : vector<4x36xf32> to vector<4x1xf32>
    %208 = vector.shape_cast %207 : vector<4x1xf32> to vector<1x4x1xf32>
    %209 = vector.extract_strided_slice %206 {offsets = [0, 0, 0], sizes = [2, 1, 256], strides = [1, 1, 1]} : vector<2x4x256xf32> to vector<2x1x256xf32>
    %210 = vector.broadcast %208 : vector<1x4x1xf32> to vector<2x4x256xf32>
    %211 = vector.broadcast %209 : vector<2x1x256xf32> to vector<2x4x256xf32>
    %212 = arith.mulf %210, %211 : vector<2x4x256xf32>
    %213 = arith.addf %201, %212 : vector<2x4x256xf32>
    %214 = vector.extract_strided_slice %38 {offsets = [0, 21], sizes = [4, 1], strides = [1, 1]} : vector<4x36xf32> to vector<4x1xf32>
    %215 = vector.shape_cast %214 : vector<4x1xf32> to vector<1x4x1xf32>
    %216 = vector.extract_strided_slice %206 {offsets = [0, 1, 0], sizes = [2, 1, 256], strides = [1, 1, 1]} : vector<2x4x256xf32> to vector<2x1x256xf32>
    %217 = vector.broadcast %215 : vector<1x4x1xf32> to vector<2x4x256xf32>
    %218 = vector.broadcast %216 : vector<2x1x256xf32> to vector<2x4x256xf32>
    %219 = arith.mulf %217, %218 : vector<2x4x256xf32>
    %220 = arith.addf %213, %219 : vector<2x4x256xf32>
    %221 = vector.extract_strided_slice %38 {offsets = [0, 22], sizes = [4, 1], strides = [1, 1]} : vector<4x36xf32> to vector<4x1xf32>
    %222 = vector.shape_cast %221 : vector<4x1xf32> to vector<1x4x1xf32>
    %223 = vector.extract_strided_slice %206 {offsets = [0, 2, 0], sizes = [2, 1, 256], strides = [1, 1, 1]} : vector<2x4x256xf32> to vector<2x1x256xf32>
    %224 = vector.broadcast %222 : vector<1x4x1xf32> to vector<2x4x256xf32>
    %225 = vector.broadcast %223 : vector<2x1x256xf32> to vector<2x4x256xf32>
    %226 = arith.mulf %224, %225 : vector<2x4x256xf32>
    %227 = arith.addf %220, %226 : vector<2x4x256xf32>
    %228 = vector.extract_strided_slice %38 {offsets = [0, 23], sizes = [4, 1], strides = [1, 1]} : vector<4x36xf32> to vector<4x1xf32>
    %229 = vector.shape_cast %228 : vector<4x1xf32> to vector<1x4x1xf32>
    %230 = vector.extract_strided_slice %206 {offsets = [0, 3, 0], sizes = [2, 1, 256], strides = [1, 1, 1]} : vector<2x4x256xf32> to vector<2x1x256xf32>
    %231 = vector.broadcast %229 : vector<1x4x1xf32> to vector<2x4x256xf32>
    %232 = vector.broadcast %230 : vector<2x1x256xf32> to vector<2x4x256xf32>
    %233 = arith.mulf %231, %232 : vector<2x4x256xf32>
    %234 = arith.addf %227, %233 : vector<2x4x256xf32>
    %c241_i32 = arith.constant 241 : i32
    %235 = tpu.dynamic_rotate %37 by %c241_i32 dim 2 : vector<2x4x256xf32>, i32 -> vector<2x4x256xf32>
    %c6 = arith.constant 6 : index
    %c0_22 = arith.constant 0 : index
    %236 = vector.load %arg1[%c6, %c0_22] : memref<9x256xf32, #tpu.memory_space<vmem>>, vector<1x256xf32>
    %237 = vector.shape_cast %236 : vector<1x256xf32> to vector<1x1x256xf32>
    %238 = vector.broadcast %237 : vector<1x1x256xf32> to vector<2x4x256xf32>
    %239 = arith.mulf %235, %238 : vector<2x4x256xf32>
    %240 = vector.extract_strided_slice %38 {offsets = [0, 24], sizes = [4, 1], strides = [1, 1]} : vector<4x36xf32> to vector<4x1xf32>
    %241 = vector.shape_cast %240 : vector<4x1xf32> to vector<1x4x1xf32>
    %242 = vector.extract_strided_slice %239 {offsets = [0, 0, 0], sizes = [2, 1, 256], strides = [1, 1, 1]} : vector<2x4x256xf32> to vector<2x1x256xf32>
    %243 = vector.broadcast %241 : vector<1x4x1xf32> to vector<2x4x256xf32>
    %244 = vector.broadcast %242 : vector<2x1x256xf32> to vector<2x4x256xf32>
    %245 = arith.mulf %243, %244 : vector<2x4x256xf32>
    %246 = arith.addf %234, %245 : vector<2x4x256xf32>
    %247 = vector.extract_strided_slice %38 {offsets = [0, 25], sizes = [4, 1], strides = [1, 1]} : vector<4x36xf32> to vector<4x1xf32>
    %248 = vector.shape_cast %247 : vector<4x1xf32> to vector<1x4x1xf32>
    %249 = vector.extract_strided_slice %239 {offsets = [0, 1, 0], sizes = [2, 1, 256], strides = [1, 1, 1]} : vector<2x4x256xf32> to vector<2x1x256xf32>
    %250 = vector.broadcast %248 : vector<1x4x1xf32> to vector<2x4x256xf32>
    %251 = vector.broadcast %249 : vector<2x1x256xf32> to vector<2x4x256xf32>
    %252 = arith.mulf %250, %251 : vector<2x4x256xf32>
    %253 = arith.addf %246, %252 : vector<2x4x256xf32>
    %254 = vector.extract_strided_slice %38 {offsets = [0, 26], sizes = [4, 1], strides = [1, 1]} : vector<4x36xf32> to vector<4x1xf32>
    %255 = vector.shape_cast %254 : vector<4x1xf32> to vector<1x4x1xf32>
    %256 = vector.extract_strided_slice %239 {offsets = [0, 2, 0], sizes = [2, 1, 256], strides = [1, 1, 1]} : vector<2x4x256xf32> to vector<2x1x256xf32>
    %257 = vector.broadcast %255 : vector<1x4x1xf32> to vector<2x4x256xf32>
    %258 = vector.broadcast %256 : vector<2x1x256xf32> to vector<2x4x256xf32>
    %259 = arith.mulf %257, %258 : vector<2x4x256xf32>
    %260 = arith.addf %253, %259 : vector<2x4x256xf32>
    %261 = vector.extract_strided_slice %38 {offsets = [0, 27], sizes = [4, 1], strides = [1, 1]} : vector<4x36xf32> to vector<4x1xf32>
    %262 = vector.shape_cast %261 : vector<4x1xf32> to vector<1x4x1xf32>
    %263 = vector.extract_strided_slice %239 {offsets = [0, 3, 0], sizes = [2, 1, 256], strides = [1, 1, 1]} : vector<2x4x256xf32> to vector<2x1x256xf32>
    %264 = vector.broadcast %262 : vector<1x4x1xf32> to vector<2x4x256xf32>
    %265 = vector.broadcast %263 : vector<2x1x256xf32> to vector<2x4x256xf32>
    %266 = arith.mulf %264, %265 : vector<2x4x256xf32>
    %267 = arith.addf %260, %266 : vector<2x4x256xf32>
    %c240_i32 = arith.constant 240 : i32
    %268 = tpu.dynamic_rotate %37 by %c240_i32 dim 2 : vector<2x4x256xf32>, i32 -> vector<2x4x256xf32>
    %c7 = arith.constant 7 : index
    %c0_23 = arith.constant 0 : index
    %269 = vector.load %arg1[%c7, %c0_23] : memref<9x256xf32, #tpu.memory_space<vmem>>, vector<1x256xf32>
    %270 = vector.shape_cast %269 : vector<1x256xf32> to vector<1x1x256xf32>
    %271 = vector.broadcast %270 : vector<1x1x256xf32> to vector<2x4x256xf32>
    %272 = arith.mulf %268, %271 : vector<2x4x256xf32>
    %273 = vector.extract_strided_slice %38 {offsets = [0, 28], sizes = [4, 1], strides = [1, 1]} : vector<4x36xf32> to vector<4x1xf32>
    %274 = vector.shape_cast %273 : vector<4x1xf32> to vector<1x4x1xf32>
    %275 = vector.extract_strided_slice %272 {offsets = [0, 0, 0], sizes = [2, 1, 256], strides = [1, 1, 1]} : vector<2x4x256xf32> to vector<2x1x256xf32>
    %276 = vector.broadcast %274 : vector<1x4x1xf32> to vector<2x4x256xf32>
    %277 = vector.broadcast %275 : vector<2x1x256xf32> to vector<2x4x256xf32>
    %278 = arith.mulf %276, %277 : vector<2x4x256xf32>
    %279 = arith.addf %267, %278 : vector<2x4x256xf32>
    %280 = vector.extract_strided_slice %38 {offsets = [0, 29], sizes = [4, 1], strides = [1, 1]} : vector<4x36xf32> to vector<4x1xf32>
    %281 = vector.shape_cast %280 : vector<4x1xf32> to vector<1x4x1xf32>
    %282 = vector.extract_strided_slice %272 {offsets = [0, 1, 0], sizes = [2, 1, 256], strides = [1, 1, 1]} : vector<2x4x256xf32> to vector<2x1x256xf32>
    %283 = vector.broadcast %281 : vector<1x4x1xf32> to vector<2x4x256xf32>
    %284 = vector.broadcast %282 : vector<2x1x256xf32> to vector<2x4x256xf32>
    %285 = arith.mulf %283, %284 : vector<2x4x256xf32>
    %286 = arith.addf %279, %285 : vector<2x4x256xf32>
    %287 = vector.extract_strided_slice %38 {offsets = [0, 30], sizes = [4, 1], strides = [1, 1]} : vector<4x36xf32> to vector<4x1xf32>
    %288 = vector.shape_cast %287 : vector<4x1xf32> to vector<1x4x1xf32>
    %289 = vector.extract_strided_slice %272 {offsets = [0, 2, 0], sizes = [2, 1, 256], strides = [1, 1, 1]} : vector<2x4x256xf32> to vector<2x1x256xf32>
    %290 = vector.broadcast %288 : vector<1x4x1xf32> to vector<2x4x256xf32>
    %291 = vector.broadcast %289 : vector<2x1x256xf32> to vector<2x4x256xf32>
    %292 = arith.mulf %290, %291 : vector<2x4x256xf32>
    %293 = arith.addf %286, %292 : vector<2x4x256xf32>
    %294 = vector.extract_strided_slice %38 {offsets = [0, 31], sizes = [4, 1], strides = [1, 1]} : vector<4x36xf32> to vector<4x1xf32>
    %295 = vector.shape_cast %294 : vector<4x1xf32> to vector<1x4x1xf32>
    %296 = vector.extract_strided_slice %272 {offsets = [0, 3, 0], sizes = [2, 1, 256], strides = [1, 1, 1]} : vector<2x4x256xf32> to vector<2x1x256xf32>
    %297 = vector.broadcast %295 : vector<1x4x1xf32> to vector<2x4x256xf32>
    %298 = vector.broadcast %296 : vector<2x1x256xf32> to vector<2x4x256xf32>
    %299 = arith.mulf %297, %298 : vector<2x4x256xf32>
    %300 = arith.addf %293, %299 : vector<2x4x256xf32>
    %c239_i32 = arith.constant 239 : i32
    %301 = tpu.dynamic_rotate %37 by %c239_i32 dim 2 : vector<2x4x256xf32>, i32 -> vector<2x4x256xf32>
    %c8 = arith.constant 8 : index
    %c0_24 = arith.constant 0 : index
    %302 = vector.load %arg1[%c8, %c0_24] : memref<9x256xf32, #tpu.memory_space<vmem>>, vector<1x256xf32>
    %303 = vector.shape_cast %302 : vector<1x256xf32> to vector<1x1x256xf32>
    %304 = vector.broadcast %303 : vector<1x1x256xf32> to vector<2x4x256xf32>
    %305 = arith.mulf %301, %304 : vector<2x4x256xf32>
    %306 = vector.extract_strided_slice %38 {offsets = [0, 32], sizes = [4, 1], strides = [1, 1]} : vector<4x36xf32> to vector<4x1xf32>
    %307 = vector.shape_cast %306 : vector<4x1xf32> to vector<1x4x1xf32>
    %308 = vector.extract_strided_slice %305 {offsets = [0, 0, 0], sizes = [2, 1, 256], strides = [1, 1, 1]} : vector<2x4x256xf32> to vector<2x1x256xf32>
    %309 = vector.broadcast %307 : vector<1x4x1xf32> to vector<2x4x256xf32>
    %310 = vector.broadcast %308 : vector<2x1x256xf32> to vector<2x4x256xf32>
    %311 = arith.mulf %309, %310 : vector<2x4x256xf32>
    %312 = arith.addf %300, %311 : vector<2x4x256xf32>
    %313 = vector.extract_strided_slice %38 {offsets = [0, 33], sizes = [4, 1], strides = [1, 1]} : vector<4x36xf32> to vector<4x1xf32>
    %314 = vector.shape_cast %313 : vector<4x1xf32> to vector<1x4x1xf32>
    %315 = vector.extract_strided_slice %305 {offsets = [0, 1, 0], sizes = [2, 1, 256], strides = [1, 1, 1]} : vector<2x4x256xf32> to vector<2x1x256xf32>
    %316 = vector.broadcast %314 : vector<1x4x1xf32> to vector<2x4x256xf32>
    %317 = vector.broadcast %315 : vector<2x1x256xf32> to vector<2x4x256xf32>
    %318 = arith.mulf %316, %317 : vector<2x4x256xf32>
    %319 = arith.addf %312, %318 : vector<2x4x256xf32>
    %320 = vector.extract_strided_slice %38 {offsets = [0, 34], sizes = [4, 1], strides = [1, 1]} : vector<4x36xf32> to vector<4x1xf32>
    %321 = vector.shape_cast %320 : vector<4x1xf32> to vector<1x4x1xf32>
    %322 = vector.extract_strided_slice %305 {offsets = [0, 2, 0], sizes = [2, 1, 256], strides = [1, 1, 1]} : vector<2x4x256xf32> to vector<2x1x256xf32>
    %323 = vector.broadcast %321 : vector<1x4x1xf32> to vector<2x4x256xf32>
    %324 = vector.broadcast %322 : vector<2x1x256xf32> to vector<2x4x256xf32>
    %325 = arith.mulf %323, %324 : vector<2x4x256xf32>
    %326 = arith.addf %319, %325 : vector<2x4x256xf32>
    %327 = vector.extract_strided_slice %38 {offsets = [0, 35], sizes = [4, 1], strides = [1, 1]} : vector<4x36xf32> to vector<4x1xf32>
    %328 = vector.shape_cast %327 : vector<4x1xf32> to vector<1x4x1xf32>
    %329 = vector.extract_strided_slice %305 {offsets = [0, 3, 0], sizes = [2, 1, 256], strides = [1, 1, 1]} : vector<2x4x256xf32> to vector<2x1x256xf32>
    %330 = vector.broadcast %328 : vector<1x4x1xf32> to vector<2x4x256xf32>
    %331 = vector.broadcast %329 : vector<2x1x256xf32> to vector<2x4x256xf32>
    %332 = arith.mulf %330, %331 : vector<2x4x256xf32>
    %333 = arith.addf %326, %332 : vector<2x4x256xf32>
    %cst_25 = arith.constant 0.000000e+00 : f32
    %334 = vector.broadcast %cst_25 : f32 to vector<2x4x256xf32>
    %335 = arith.maximumf %333, %334 : vector<2x4x256xf32>
    %c0_26 = arith.constant 0 : index
    %c0_27 = arith.constant 0 : index
    %336 = vector.load %arg8[%c0_26, %c0_27] : memref<2x4xf32, #tpu.memory_space<vmem>>, vector<2x4xf32>
    %c0_28 = arith.constant 0 : index
    %c0_29 = arith.constant 0 : index
    %337 = vector.load %arg9[%c0_28, %c0_29] : memref<2x1xf32, #tpu.memory_space<vmem>>, vector<2x1xf32>
    %338 = vector.shape_cast %337 : vector<2x1xf32> to vector<1x2x1xf32>
    %339 = vector.extract_strided_slice %336 {offsets = [0, 0], sizes = [2, 1], strides = [1, 1]} : vector<2x4xf32> to vector<2x1xf32>
    %340 = vector.shape_cast %339 : vector<2x1xf32> to vector<1x2x1xf32>
    %341 = vector.extract_strided_slice %335 {offsets = [0, 0, 0], sizes = [2, 1, 256], strides = [1, 1, 1]} : vector<2x4x256xf32> to vector<2x1x256xf32>
    %342 = vector.broadcast %340 : vector<1x2x1xf32> to vector<2x2x256xf32>
    %343 = vector.broadcast %341 : vector<2x1x256xf32> to vector<2x2x256xf32>
    %344 = arith.mulf %342, %343 : vector<2x2x256xf32>
    %345 = vector.broadcast %338 : vector<1x2x1xf32> to vector<2x2x256xf32>
    %346 = arith.addf %345, %344 : vector<2x2x256xf32>
    %347 = vector.extract_strided_slice %336 {offsets = [0, 1], sizes = [2, 1], strides = [1, 1]} : vector<2x4xf32> to vector<2x1xf32>
    %348 = vector.shape_cast %347 : vector<2x1xf32> to vector<1x2x1xf32>
    %349 = vector.extract_strided_slice %335 {offsets = [0, 1, 0], sizes = [2, 1, 256], strides = [1, 1, 1]} : vector<2x4x256xf32> to vector<2x1x256xf32>
    %350 = vector.broadcast %348 : vector<1x2x1xf32> to vector<2x2x256xf32>
    %351 = vector.broadcast %349 : vector<2x1x256xf32> to vector<2x2x256xf32>
    %352 = arith.mulf %350, %351 : vector<2x2x256xf32>
    %353 = arith.addf %346, %352 : vector<2x2x256xf32>
    %354 = vector.extract_strided_slice %336 {offsets = [0, 2], sizes = [2, 1], strides = [1, 1]} : vector<2x4xf32> to vector<2x1xf32>
    %355 = vector.shape_cast %354 : vector<2x1xf32> to vector<1x2x1xf32>
    %356 = vector.extract_strided_slice %335 {offsets = [0, 2, 0], sizes = [2, 1, 256], strides = [1, 1, 1]} : vector<2x4x256xf32> to vector<2x1x256xf32>
    %357 = vector.broadcast %355 : vector<1x2x1xf32> to vector<2x2x256xf32>
    %358 = vector.broadcast %356 : vector<2x1x256xf32> to vector<2x2x256xf32>
    %359 = arith.mulf %357, %358 : vector<2x2x256xf32>
    %360 = arith.addf %353, %359 : vector<2x2x256xf32>
    %361 = vector.extract_strided_slice %336 {offsets = [0, 3], sizes = [2, 1], strides = [1, 1]} : vector<2x4xf32> to vector<2x1xf32>
    %362 = vector.shape_cast %361 : vector<2x1xf32> to vector<1x2x1xf32>
    %363 = vector.extract_strided_slice %335 {offsets = [0, 3, 0], sizes = [2, 1, 256], strides = [1, 1, 1]} : vector<2x4x256xf32> to vector<2x1x256xf32>
    %364 = vector.broadcast %362 : vector<1x2x1xf32> to vector<2x2x256xf32>
    %365 = vector.broadcast %363 : vector<2x1x256xf32> to vector<2x2x256xf32>
    %366 = arith.mulf %364, %365 : vector<2x2x256xf32>
    %367 = arith.addf %360, %366 : vector<2x2x256xf32>
    %cst_30 = arith.constant 0.000000e+00 : f32
    %368 = vector.broadcast %cst_30 : f32 to vector<2x2x256xf32>
    %369 = arith.subf %368, %367 : vector<2x2x256xf32>
    %370 = math.exp %369 : vector<2x2x256xf32>
    %cst_31 = arith.constant 1.000000e+00 : f32
    %371 = vector.broadcast %cst_31 : f32 to vector<2x2x256xf32>
    %372 = arith.addf %371, %370 : vector<2x2x256xf32>
    %373 = tpu.reciprocal %372 {approx = true} : vector<2x2x256xf32> -> vector<2x2x256xf32>
    %374 = vector.extract_strided_slice %373 {offsets = [0, 0, 0], sizes = [2, 1, 256], strides = [1, 1, 1]} : vector<2x2x256xf32> to vector<2x1x256xf32>
    %375 = vector.broadcast %374 : vector<2x1x256xf32> to vector<2x4x256xf32>
    %376 = arith.mulf %0, %375 : vector<2x4x256xf32>
    %c0_32 = arith.constant 0 : index
    %c0_33 = arith.constant 0 : index
    %c0_34 = arith.constant 0 : index
    %377 = vector.load %arg10[%c0_32, %c0_33, %c0_34] : memref<2x4x256xf32, #tpu.memory_space<vmem>>, vector<2x4x256xf32>
    tpu.vector_store %arg10[%c0_32, %c0_33, %c0_34], %376 {strides = array<i32>} : memref<2x4x256xf32, #tpu.memory_space<vmem>>, vector<2x4x256xf32>,
    %378 = vector.extract_strided_slice %373 {offsets = [0, 1, 0], sizes = [2, 1, 256], strides = [1, 1, 1]} : vector<2x2x256xf32> to vector<2x1x256xf32>
    %379 = vector.broadcast %378 : vector<2x1x256xf32> to vector<2x4x256xf32>
    %380 = arith.mulf %1, %379 : vector<2x4x256xf32>
    %c0_35 = arith.constant 0 : index
    %c0_36 = arith.constant 0 : index
    %c0_37 = arith.constant 0 : index
    %381 = vector.load %arg11[%c0_35, %c0_36, %c0_37] : memref<2x4x256xf32, #tpu.memory_space<vmem>>, vector<2x4x256xf32>
    tpu.vector_store %arg11[%c0_35, %c0_36, %c0_37], %380 {strides = array<i32>} : memref<2x4x256xf32, #tpu.memory_space<vmem>>, vector<2x4x256xf32>,
    return
  }
  func.func @transform_0(%arg0: i32) -> (i32, i32) {
    %c0_i32 = arith.constant 0 : i32
    %c0_i32_0 = arith.constant 0 : i32
    %c0_i32_1 = arith.constant 0 : i32
    return %c0_i32, %c0_i32_0 : i32, i32
  }
  func.func @transform_1(%arg0: i32) -> (i32, i32, i32) {
    %c0_i32 = arith.constant 0 : i32
    %c0_i32_0 = arith.constant 0 : i32
    %c0_i32_1 = arith.constant 0 : i32
    return %arg0, %c0_i32, %c0_i32_0 : i32, i32, i32
  }
  func.func @transform_2(%arg0: i32) -> (i32, i32, i32) {
    %c0_i32 = arith.constant 0 : i32
    %c0_i32_0 = arith.constant 0 : i32
    %c0_i32_1 = arith.constant 0 : i32
    return %arg0, %c0_i32, %c0_i32_0 : i32, i32, i32
  }
  func.func @transform_3(%arg0: i32) -> (i32, i32) {
    %c0_i32 = arith.constant 0 : i32
    %c0_i32_0 = arith.constant 0 : i32
    %c0_i32_1 = arith.constant 0 : i32
    return %c0_i32, %c0_i32_0 : i32, i32
  }
  func.func @transform_4(%arg0: i32) -> (i32, i32) {
    %c0_i32 = arith.constant 0 : i32
    %c0_i32_0 = arith.constant 0 : i32
    %c0_i32_1 = arith.constant 0 : i32
    return %c0_i32, %c0_i32_0 : i32, i32
  }
  func.func @transform_5(%arg0: i32) -> (i32, i32) {
    %c0_i32 = arith.constant 0 : i32
    %c0_i32_0 = arith.constant 0 : i32
    %c0_i32_1 = arith.constant 0 : i32
    return %c0_i32, %c0_i32_0 : i32, i32
  }
  func.func @transform_6(%arg0: i32) -> (i32, i32) {
    %c0_i32 = arith.constant 0 : i32
    %c0_i32_0 = arith.constant 0 : i32
    %c0_i32_1 = arith.constant 0 : i32
    return %c0_i32, %c0_i32_0 : i32, i32
  }
  func.func @transform_7(%arg0: i32) -> (i32, i32) {
    %c0_i32 = arith.constant 0 : i32
    %c0_i32_0 = arith.constant 0 : i32
    %c0_i32_1 = arith.constant 0 : i32
    return %c0_i32, %c0_i32_0 : i32, i32
  }
  func.func @transform_8(%arg0: i32) -> (i32, i32) {
    %c0_i32 = arith.constant 0 : i32
    %c0_i32_0 = arith.constant 0 : i32
    %c0_i32_1 = arith.constant 0 : i32
    return %c0_i32, %c0_i32_0 : i32, i32
  }
  func.func @transform_9(%arg0: i32) -> (i32, i32, i32) {
    %c0_i32 = arith.constant 0 : i32
    %c0_i32_0 = arith.constant 0 : i32
    %c0_i32_1 = arith.constant 0 : i32
    return %arg0, %c0_i32, %c0_i32_0 : i32, i32, i32
  }
  func.func @transform_10(%arg0: i32) -> (i32, i32, i32) {
    %c0_i32 = arith.constant 0 : i32
    %c0_i32_0 = arith.constant 0 : i32
    %c0_i32_1 = arith.constant 0 : i32
    return %arg0, %c0_i32, %c0_i32_0 : i32, i32, i32
  }
}

</mosaic_0001>

<bundles_post_ra>
// kernel: tpu_custom_call.1
= control target key start
LH: loop header
LB: loop body
LE: loop exit
PB: predicated region body
PF: predicated region fallthrough
CT: control target
= control target key end

     0   :  { %16 = vsyncpa [#allocation3], 0  ;;  %s2946_s0 = inlined_call_operand.hbm [shape: f32[9,256], index: 0, kind: input, shape index: {}]   ;;  %s2947_s1 = inlined_call_operand.vmem [shape: f32[2,4,256], index: 1, kind: input, shape index: {}]   ;;  %s2948_s2 = inlined_call_operand.hbm [shape: f32[2,4,256], index: 2, kind: input, shape index: {}]   ;;  %s2949_s3 = inlined_call_operand.vmem [shape: f32[4,4], index: 3, kind: input, shape index: {}]   ;;  %s2950_s4 = inlined_call_operand.vmem [shape: f32[4,1], index: 4, kind: input, shape index: {}]   ;;  %s2951_s5 = inlined_call_operand.vmem [shape: f32[4,36], index: 5, kind: input, shape index: {}]   ;;  %s2952_s6 = inlined_call_operand.vmem [shape: f32[4,1], index: 6, kind: input, shape index: {}]   ;;  %s2953_s7 = inlined_call_operand.vmem [shape: f32[2,4], index: 7, kind: input, shape index: {}]   ;;  %s2954_s8 = inlined_call_operand.vmem [shape: f32[2,1], index: 8, kind: input, shape index: {}]   ;;  %s2955_s9 = inlined_call_operand.hbm [shape: f32[2,4,256], index: 9, kind: output, shape index: {0}]   ;;  %s2956_s10 = inlined_call_operand.hbm [shape: f32[2,4,256], index: 10, kind: output, shape index: {1}]  }
   0x1   :  { %17 = vsyncpa [#allocation6], 0 }
   0x2   :  { %18 = vsyncpa [#allocation4], 0 }
   0x3   :  { %19 = vsyncpa [#allocation9], 0  ;;  %s1958_s13 = smov [#allocation2]   ;;  %s1862_s17 = scalar_lea.hbm %s2946_s0, 512 }
   0x4   :  { %s25_s14 = sshll.u32 %s1958_s13, 4  ;;  %p1863_p0 = scmp.ne.s32.totalorder %s2946_s0, %s1862_s17  ;;  %s26_s14 = int_to_ptr.vmem [resolvable:$true] %s25_s14 }
   0x5   :  { %p1866_p1 = scmp.lt.u32.totalorder %s1862_s17, %s2946_s0 }
   0x7   :  { %p1868_p2 = pnand %p1866_p1, %p1863_p0 }
   0x9   :  { %1871 = shalt.err (!%p1868_p2)
}
   0xa   :  { %s1872_s22 = scalar_lea.vmem %s26_s14, 512  ;;  %p1877_p4 = scmp.lt.s32.totalorder %s26_s14, %s26_s14 }
   0xb   :  { %p1873_p3 = scmp.ne.s32.totalorder %s26_s14, %s1872_s22  ;;  %p1878_p5 = scmp.lt.s32.totalorder %s1872_s22, %s1872_s22 }
   0xd   :  { %p1879_p6 = por %p1878_p5, %p1877_p4 }
   0xf   :  { %p1880_p7 = pnand %p1879_p6, %p1873_p3 }
  0x11   :  { %1883 = shalt.err (!%p1880_p7)
}
  0x12   :  { %s1959_s23 = smov 256   ;;  %s1960_s24 = smov 16  }
  0x13   :  { %31 = dma.hbm_to_vmem [thread:$0]  %s2946_s0, 512, %s26_s14, [#allocation3], %s1959_s23, %s1959_s23, %s1960_s24  }
  0x14   :  { %s1961_s27 = smov [#allocation5]   ;;  %s1884_s11 = scalar_lea.hbm %s2948_s2, 256 }
  0x15   :  { %s39_s28 = sshll.u32 %s1961_s27, 4  ;;  %p1885_p8 = scmp.ne.s32.totalorder %s2948_s2, %s1884_s11  ;;  %s40_s28 = int_to_ptr.vmem [resolvable:$true] %s39_s28 }
  0x16   :  { %p1888_p9 = scmp.lt.u32.totalorder %s1884_s11, %s2948_s2 }
  0x18   :  { %p1890_p10 = pnand %p1888_p9, %p1885_p8 }
  0x1a   :  { %1893 = shalt.err (!%p1890_p10)
}
  0x1b   :  { %s1894_s17 = scalar_lea.vmem %s40_s28, 256  ;;  %p1899_p12 = scmp.lt.s32.totalorder %s40_s28, %s40_s28 }
  0x1c   :  { %p1895_p11 = scmp.ne.s32.totalorder %s40_s28, %s1894_s17  ;;  %p1900_p13 = scmp.lt.s32.totalorder %s1894_s17, %s1894_s17 }
  0x1e   :  { %p1901_p0 = por %p1900_p13, %p1899_p12 }
  0x20   :  { %p1902_p1 = pnand %p1901_p0, %p1895_p11 }
  0x22   :  { %1905 = shalt.err (!%p1902_p1)
}
  0x23   :  { %s1962_s0 = smov 128   ;;  %s1963_s14 = smov 8  }
  0x24   :  { %45 = dma.hbm_to_vmem [thread:$0]  %s2948_s2, 256, %s40_s28, [#allocation6], %s1962_s0, %s1962_s0, %s1963_s14  }
  0x25   :  { %1950 = dma.done.wait [#allocation3], 512  }
  0x26   :  { %1951 = vsyncadd [#allocation3], 4294966784 }
  0x27   :  { %1952 = dma.done.wait [#allocation6], 256  }
  0x28   :  { %1953 = vsyncadd [#allocation6], 4294967040  ;;  %v1964_v0 = vmov 1   ;;  %v1965_v1 = vmov 0   ;;  %v193_v2 = vld [vmem:[%s2949_s3] sm:$0xf] }
  0x29   :  { %1792 = vset.pattern.permute.xlu1 %v1964_v0  ;;  %1791 = vset.pattern.permute.xlu0 %v1965_v1  ;;  %v1966_v3 = vmov 2   ;;  %v1967_v4 = vmov 3   ;;  %v250_v5 = vld [vmem:[%s2952_s6] sm:$0xf]  ;;  %v1968_v8 = vmov 5   ;;  %v1969_v9 = vmov 4  }
  0x2a   :  { %214 = vperm.xlu1 %1792, %v193_v2   ;;  %197 = vperm.xlu0 %1791, %v193_v2   ;;  %v194_v6 = vld [vmem:[%s2950_s4] sm:$0xf]  ;;  %v1970_v10 = vmov 8   ;;  %v1971_v11 = vmov 6   ;;  %v1972_v12 = vmov 11   ;;  %v1973_v13 = vmov 7  }
  0x2b   :  { %v2110_v7 = vld [vmem:[%s2951_s5] sm:$0xf]  ;;  %v1974_v14 = vmov 14   ;;  %v1975_v15 = vmov 9   ;;  %v1976_v16 = vmov 17   ;;  %v1977_v17 = vmov 10  }
  0x2c   :  { %v1978_v18 = vmov 20   ;;  %v1979_v19 = vmov 12   ;;  %v1980_v20 = vmov 21   ;;  %v1981_v21 = vmov 13   ;;  %v64_v34 = vld [vmem:[%s2947_s1] sm:$0xff]  ;;  %v65_v35 = vld [vmem:[%s2947_s1 + $0x8] sm:$0xff] }
  0x2d   :  { %v1982_v22 = vmov 24   ;;  %v1983_v23 = vmov 15   ;;  %v1984_v24 = vmov 25   ;;  %v1985_v25 = vmov 16   ;;  %v66_v38 = vld [vmem:[#allocation5] sm:$0xff]  ;;  %v67_v51 = vld [vmem:[#allocation5 + $0x8] sm:$0xff] }
  0x2e   :  { %1793 = vset.pattern.permute.xlu1 %v1966_v3  ;;  %1794 = vset.pattern.permute.xlu0 %v1967_v4  ;;  %v1986_v26 = vmov 28   ;;  %v1987_v27 = vmov 18   ;;  %v1988_v28 = vmov 19   ;;  %v1989_v29 = vmov 22   ;;  %s1994_s28 = smov 17   ;;  %s1995_s29 = smov 15  }
  0x2f   :  { %226 = vperm.xlu1 %1793, %v193_v2   ;;  %238 = vperm.xlu0 %1794, %v193_v2   ;;  %v1990_v30 = vmov 23   ;;  %v1991_v31 = vmov 26   ;;  %v1992_v32 = vmov 27   ;;  %v1993_v33 = vmov 30   ;;  %s1996_s30 = smov 1   ;;  %s1999_s11 = smov 113  }
  0x30   :  { %vm74_vm0 = vcmask 1043456   ;;  %v70_v36 = vcombine.high %v64_v34, %v64_v34  ;;  %v71_v37 = vcombine.high %v65_v35, %v65_v35  ;;  %v133_v42 = vcombine.high %v66_v38, %v66_v38  ;;  %s2000_s12 = smov 112   ;;  %s2002_s13 = smov 111  }
  0x31   :  { %v75_v39 = vsel %vm74_vm0, %v64_v34, -inf  ;;  %v89_v41 = vsel %vm74_vm0, %v65_v35, -inf  ;;  %v103_v45 = vsel %vm74_vm0, %v64_v34, 0.0  ;;  %v117_v47 = vsel %vm74_vm0, %v65_v35, 0.0  ;;  %s2008_s21 = smov [#allocation8]  }
  0x32   :  { %v82_v40 = vsel %vm74_vm0, %v70_v36, -inf  ;;  %v76_v43 = vrot.slane %v75_v39, 4  ;;  %v96_v44 = vsel %vm74_vm0, %v71_v37, -inf  ;;  %v110_v46 = vsel %vm74_vm0, %v70_v36, 0.0  ;;  %s1723_s2 = sshll.u32 %s2008_s21, 4  ;;  %s2909_s2 = int_to_ptr.vmem [resolvable:$true] %s1723_s2 }
  0x33   :  { %1796 = vset.pattern.permute.xlu1 %v1965_v1  ;;  %1795 = vset.pattern.permute.xlu0 %v1965_v1  ;;  %v137_v48 = vsel %vm74_vm0, %v66_v38, -inf  ;;  %v83_v49 = vrot.slane %v82_v40, 4  ;;  %v90_v50 = vrot.slane %v89_v41, 4  ;;  %v165_v52 = vsel %vm74_vm0, %v66_v38, 0.0 }
  0x34   :  { %309 = vperm.xlu1 %1796, %v250_v5   ;;  %206 = vperm.xlu0 %1795, %v194_v6   ;;  %v144_v53 = vsel %vm74_vm0, %v133_v42, -inf  ;;  %v97_v54 = vrot.slane %v96_v44, 4  ;;  %v172_v55 = vsel %vm74_vm0, %v133_v42, 0.0  ;;  %v124_v56 = vsel %vm74_vm0, %v71_v37, 0.0 }
  0x35   :  { %v151_v57 = vsel %vm74_vm0, %v67_v51, -inf  ;;  %v104_v58 = vrot.slane %v103_v45, 4  ;;  %v111_v59 = vrot.slane %v110_v46, 4  ;;  %v118_v60 = vrot.slane %v117_v47, 4 }
  0x36   :  { %v138_v61 = vrot.slane %v137_v48, 4  ;;  %v134_v62 = vcombine.high %v67_v51, %v67_v51  ;;  %v166_v63 = vrot.slane %v165_v52, 4  ;;  %v179_v2 = vsel %vm74_vm0, %v67_v51, 0.0 }
  0x37   :  { %v145_v5 = vrot.slane %v144_v53, 4  ;;  %v77_v6 = vmax.f32 %v75_v39, %v76_v43 }
  0x38   :  { %1797 = vset.pattern.permute.xlu1 %v1964_v0  ;;  %284 = vperm.xlu0 %1795, %v2110_v7  }
  0x39   :  { %317 = vperm.xlu1 %1797, %v2110_v7  }
  0x3c   :  { %1798 = vset.pattern.permute.xlu0 %v1966_v3 }
  0x3d   :  { %1799 = vset.pattern.permute.xlu1 %v1967_v4  ;;  %345 = vperm.xlu0 %1798, %v2110_v7  }
  0x3e   :  { %373 = vperm.xlu1 %1799, %v2110_v7  }
  0x41   :  { %1801 = vset.pattern.permute.xlu0 %v1968_v8  ;;  %v173_v8 = vrot.slane %v172_v55, 4 }
  0x42   :  { %1800 = vset.pattern.permute.xlu1 %v1969_v9  ;;  %459 = vperm.xlu0 %1801, %v2110_v7   ;;  %v125_v9 = vrot.slane %v124_v56, 4 }
  0x43   :  { %431 = vperm.xlu1 %1800, %v2110_v7  }
  0x46   :  { %1804 = vset.pattern.permute.xlu0 %v1970_v10  ;;  %v152_v10 = vrot.slane %v151_v57, 4 }
  0x47   :  { %1802 = vset.pattern.permute.xlu1 %v1971_v11  ;;  %573 = vperm.xlu0 %1804, %v2110_v7   ;;  %v84_v11 = vmax.f32 %v82_v40, %v83_v49 }
  0x48   :  { %487 = vperm.xlu1 %1802, %v2110_v7  }
  0x4b   :  { %1807 = vset.pattern.permute.xlu0 %v1972_v12  ;;  %v91_v12 = vmax.f32 %v89_v41, %v90_v50 }
  0x4c   :  { %1803 = vset.pattern.permute.xlu1 %v1973_v13  ;;  %657 = vperm.xlu0 %1807, %v2110_v7   ;;  %v98_v13 = vmax.f32 %v96_v44, %v97_v54 }
  0x4d   :  { %515 = vperm.xlu1 %1803, %v2110_v7  }
  0x50   :  { %1810 = vset.pattern.permute.xlu0 %v1974_v14  ;;  %v158_v14 = vsel %vm74_vm0, %v134_v62, -inf }
  0x51   :  { %1805 = vset.pattern.permute.xlu1 %v1975_v15  ;;  %771 = vperm.xlu0 %1810, %v2110_v7   ;;  %v105_v15 = vadd.f32 %v104_v58, %v103_v45 }
  0x52   :  { %601 = vperm.xlu1 %1805, %v2110_v7  }
  0x55   :  { %1813 = vset.pattern.permute.xlu0 %v1976_v16  ;;  %v112_v16 = vadd.f32 %v111_v59, %v110_v46 }
  0x56   :  { %1806 = vset.pattern.permute.xlu1 %v1977_v17  ;;  %855 = vperm.xlu0 %1813, %v2110_v7   ;;  %v119_v17 = vadd.f32 %v118_v60, %v117_v47 }
  0x57   :  { %629 = vperm.xlu1 %1806, %v2110_v7  }
  0x5a   :  { %1816 = vset.pattern.permute.xlu0 %v1978_v18  ;;  %v139_v18 = vmax.f32 %v137_v48, %v138_v61 }
  0x5b   :  { %1808 = vset.pattern.permute.xlu1 %v1979_v19  ;;  %969 = vperm.xlu0 %1816, %v2110_v7   ;;  %v167_v19 = vadd.f32 %v166_v63, %v165_v52 }
  0x5c   :  { %715 = vperm.xlu1 %1808, %v2110_v7   ;;  %v140_v34 = vrot.slane %v139_v18, 2 }
  0x5d   :  { %v168_v35 = vrot.slane %v167_v19, 2 }
  0x5e   :  { %v141_v50 = vmax.f32 %v139_v18, %v140_v34 }
  0x5f   :  { %1817 = vset.pattern.permute.xlu0 %v1980_v20  ;;  %v180_v20 = vrot.slane %v179_v2, 4  ;;  %v169_v51 = vadd.f32 %v168_v35, %v167_v19 }
  0x60   :  { %1809 = vset.pattern.permute.xlu1 %v1981_v21  ;;  %997 = vperm.xlu0 %1817, %v2110_v7   ;;  %v186_v21 = vsel %vm74_vm0, %v134_v62, 0.0 }
  0x61   :  { %743 = vperm.xlu1 %1809, %v2110_v7   ;;  %v181_v36 = vadd.f32 %v180_v20, %v179_v2  ;;  %v187_v37 = vrot.slane %v186_v21, 4 }
  0x63   :  { %v182_v52 = vrot.slane %v181_v36, 2 }
  0x64   :  { %1820 = vset.pattern.permute.xlu0 %v1982_v22  ;;  %v146_v22 = vmax.f32 %v144_v53, %v145_v5  ;;  %v188_v53 = vadd.f32 %v187_v37, %v186_v21 }
  0x65   :  { %1811 = vset.pattern.permute.xlu1 %v1983_v23  ;;  %1111 = vperm.xlu0 %1820, %v2110_v7   ;;  %v174_v23 = vadd.f32 %v173_v8, %v172_v55 }
  0x66   :  { %799 = vperm.xlu1 %1811, %v2110_v7   ;;  %v147_v38 = vrot.slane %v146_v22, 2 }
  0x67   :  { %v175_v39 = vrot.slane %v174_v23, 2 }
  0x68   :  { %v148_v54 = vmax.f32 %v146_v22, %v147_v38 }
  0x69   :  { %1821 = vset.pattern.permute.xlu0 %v1984_v24  ;;  %v126_v24 = vadd.f32 %v125_v9, %v124_v56  ;;  %v176_v56 = vadd.f32 %v175_v39, %v174_v23  ;;  %v142_v9 = vrot.slane %v141_v50, 1 }
  0x6a   :  { %1812 = vset.pattern.permute.xlu1 %v1985_v25  ;;  %1139 = vperm.xlu0 %1821, %v2110_v7   ;;  %v153_v25 = vmax.f32 %v151_v57, %v152_v10  ;;  %v170_v10 = vrot.slane %v169_v51, 1 }
  0x6b   :  { %827 = vperm.xlu1 %1812, %v2110_v7   ;;  %v127_v40 = vrot.slane %v126_v24, 2 }
  0x6c   :  { %v154_v41 = vrot.slane %v153_v25, 2 }
  0x6d   :  { %v128_v58 = vadd.f32 %v127_v40, %v126_v24 }
  0x6e   :  { %1824 = vset.pattern.permute.xlu0 %v1986_v26  ;;  %v159_v26 = vrot.slane %v158_v14, 4  ;;  %v155_v59 = vmax.f32 %v153_v25, %v154_v41 }
  0x6f   :  { %1814 = vset.pattern.permute.xlu1 %v1987_v27  ;;  %v78_v27 = vrot.slane %v77_v6, 2 }
  0x70   :  { %883 = vperm.xlu1 %1814, %v2110_v7   ;;  %v160_v42 = vmax.f32 %v158_v14, %v159_v26  ;;  %v177_v14 = vrot.slane %v176_v56, 1 }
  0x71   :  { %v79_v43 = vmax.f32 %v77_v6, %v78_v27  ;;  %v143_v27 = vmax.f32 %v141_v50, %v142_v9 }
  0x72   :  { %v161_v60 = vrot.slane %v160_v42, 2 }
  0x73   :  { %v80_v61 = vrot.slane %v79_v43, 1 }
  0x74   :  { %1815 = vset.pattern.permute.xlu1 %v1988_v28  ;;  %v85_v28 = vrot.slane %v84_v11, 2 }
  0x75   :  { %911 = vperm.xlu1 %1815, %v2110_v7   ;;  %v81_v18 = vmax.f32 %v79_v43, %v80_v61 }
  0x76   :  { %v86_v44 = vmax.f32 %v84_v11, %v85_v28  ;;  %v183_v11 = vadd.f32 %v182_v52, %v181_v36  ;;  %v171_v28 = vadd.f32 %v170_v10, %v169_v51 }
  0x78   :  { %v87_v62 = vrot.slane %v86_v44, 1 }
  0x79   :  { %1818 = vset.pattern.permute.xlu1 %v1989_v29  ;;  %v92_v29 = vrot.slane %v91_v12, 2 }
  0x7a   :  { %1025 = vperm.xlu1 %1818, %v2110_v7   ;;  %v88_v19 = vmax.f32 %v86_v44, %v87_v62 }
  0x7b   :  { %v93_v45 = vmax.f32 %v91_v12, %v92_v29  ;;  %v189_v12 = vrot.slane %v188_v53, 2  ;;  %v184_v29 = vrot.slane %v183_v11, 1 }
  0x7d   :  { %v94_v63 = vrot.slane %v93_v45, 1 }
  0x7e   :  { %1819 = vset.pattern.permute.xlu1 %v1990_v30  ;;  %v99_v30 = vrot.slane %v98_v13, 2 }
  0x7f   :  { %1053 = vperm.xlu1 %1819, %v2110_v7   ;;  %v95_v20 = vmax.f32 %v93_v45, %v94_v63 }
  0x80   :  { %v100_v46 = vmax.f32 %v98_v13, %v99_v30  ;;  %v149_v13 = vrot.slane %v148_v54, 1  ;;  %v190_v30 = vadd.f32 %v189_v12, %v188_v53 }
  0x82   :  { %v101_v2 = vrot.slane %v100_v46, 1 }
  0x83   :  { %1822 = vset.pattern.permute.xlu1 %v1991_v31  ;;  %v106_v31 = vrot.slane %v105_v15, 2 }
  0x84   :  { %1167 = vperm.xlu1 %1822, %v2110_v7   ;;  %v102_v21 = vmax.f32 %v100_v46, %v101_v2 }
  0x85   :  { %v107_v47 = vadd.f32 %v106_v31, %v105_v15  ;;  %v129_v15 = vrot.slane %v128_v58, 1  ;;  %v150_v31 = vmax.f32 %v148_v54, %v149_v13 }
  0x87   :  { %v108_v5 = vrot.slane %v107_v47, 1 }
  0x88   :  { %1823 = vset.pattern.permute.xlu1 %v1992_v32  ;;  %v113_v32 = vrot.slane %v112_v16, 2 }
  0x89   :  { %1195 = vperm.xlu1 %1823, %v2110_v7   ;;  %v109_v23 = vadd.f32 %v108_v5, %v107_v47 }
  0x8a   :  { %v114_v48 = vadd.f32 %v113_v32, %v112_v16  ;;  %v156_v16 = vrot.slane %v155_v59, 1  ;;  %v178_v32 = vadd.f32 %v177_v14, %v176_v56 }
  0x8c   :  { %v115_v6 = vrot.slane %v114_v48, 1  ;;  %v157_v34 = vmax.f32 %v155_v59, %v156_v16  ;;  %v191_v59 = vrot.slane %v190_v30, 1 }
  0x8d   :  { %1826 = vset.pattern.permute.xlu1 %v1993_v33  ;;  %v120_v33 = vrot.slane %v119_v17, 2 }
  0x8e   :  { %v116_v24 = vadd.f32 %v115_v6, %v114_v48  ;;  %v192_v12 = vadd.f32 %v191_v59, %v190_v30  ;;  %v1511_v59 = vld [vmem:[%s2954_s8] sm:$0x3]  ;;  %s2007_s8 = smov [#allocation7]  }
  0x8f   :  { %v121_v49 = vadd.f32 %v120_v33, %v119_v17  ;;  %v162_v17 = vmax.f32 %v160_v42, %v161_v60  ;;  %v130_v33 = vadd.f32 %v129_v15, %v128_v58  ;;  %v185_v58 = vadd.f32 %v184_v29, %v183_v11  ;;  %s1711_s18 = sshll.u32 %s2007_s8, 4  ;;  %s1712_s18 = int_to_ptr.vmem [resolvable:$true] %s1711_s18 }
  0x90   :  { %s1906_s25 = scalar_lea.vmem %s1712_s18, 256  ;;  %p1911_p3 = scmp.lt.s32.totalorder %s1712_s18, %s1712_s18 }
  0x91   :  { %v122_v8 = vrot.slane %v121_v49, 1  ;;  %v163_v35 = vrot.slane %v162_v17, 1  ;;  %p1907_p2 = scmp.ne.s32.totalorder %s1712_s18, %s1906_s25  ;;  %p1912_p4 = scmp.lt.s32.totalorder %s1906_s25, %s1906_s25 }
  0x93   :  { %v123_v25 = vadd.f32 %v122_v8, %v121_v49  ;;  %v164_v50 = vmax.f32 %v162_v17, %v163_v35  ;;  %p1913_p5 = por %p1912_p4, %p1911_p3 }
  0x95   :  { %p1914_p6 = pnand %p1913_p5, %p1907_p2 }
  0xa9   :  { %v198_v55 = vpop.permute.xlu0 %197  ;;  %v215_v57 = vpop.permute.xlu1 %214 }
  0xaa   :  { %v200_v36 = vmul.f32 %v198_v55, %v81_v18  ;;  %v201_v37 = vmul.f32 %v198_v55, %v88_v19  ;;  %v202_v38 = vmul.f32 %v198_v55, %v95_v20  ;;  %v203_v39 = vmul.f32 %v198_v55, %v102_v21 }
  0xab   :  { %v217_v40 = vmul.f32 %v215_v57, %v109_v23  ;;  %v218_v41 = vmul.f32 %v215_v57, %v116_v24  ;;  %v219_v42 = vmul.f32 %v215_v57, %v123_v25  ;;  %v220_v55 = vmul.f32 %v215_v57, %v130_v33 }
  0xac   :  { %v259_v23 = vlaneseq  ;;  %v1998_v24 = vmov 29   ;;  %v2001_v33 = vmov 32  }
  0xae   :  { %v239_v22 = vpop.permute.xlu0 %238  ;;  %v227_v26 = vpop.permute.xlu1 %226 }
  0xaf   :  { %v229_v44 = vmul.f32 %v227_v26, %v143_v27  ;;  %v230_v49 = vmul.f32 %v227_v26, %v150_v31  ;;  %v231_v51 = vmul.f32 %v227_v26, %v157_v34  ;;  %v241_v60 = vmul.f32 %v239_v22, %v171_v28 }
  0xb0   :  { %v242_v61 = vmul.f32 %v239_v22, %v178_v32  ;;  %v232_v5 = vmul.f32 %v227_v26, %v164_v50  ;;  %v243_v13 = vmul.f32 %v239_v22, %v185_v58  ;;  %v244_v15 = vmul.f32 %v239_v22, %v192_v12 }
  0xb1   :  { %v2219_v26 = vshrl.u32 %v259_v23, 7  ;;  %v2006_v58 = vmov 35  }
  0xb3   :  { %v207_v43 = vpop.permute.xlu0 %206  ;;  %v2165_v45 = vpop.permute.xlu1 %309  ;;  %v2227_v28 = vsub.s32 0, %v2219_v26  ;;  %v2236_v31 = vsub.s32 2, %v2219_v26 }
  0xb4   :  { %v209_v46 = vadd.f32 %v207_v43, %v200_v36  ;;  %v210_v47 = vadd.f32 %v207_v43, %v201_v37  ;;  %v211_v48 = vadd.f32 %v207_v43, %v202_v38  ;;  %v212_v52 = vadd.f32 %v207_v43, %v203_v39 }
  0xb5   :  { %v2249_v36 = vsub.s32 3, %v2219_v26  ;;  %v2003_v39 = vmov 33  }
  0xb6   :  { %v221_v53 = vadd.f32 %v217_v40, %v209_v46  ;;  %v222_v54 = vadd.f32 %v218_v41, %v210_v47  ;;  %v223_v56 = vadd.f32 %v219_v42, %v211_v48  ;;  %v224_v6 = vadd.f32 %v220_v55, %v212_v52 }
  0xb7   :  { %v2251_v37 = vpop.permute.xlu0 %284 }
  0xb8   :  { %v233_v62 = vadd.f32 %v229_v44, %v221_v53  ;;  %v234_v63 = vadd.f32 %v230_v49, %v222_v54  ;;  %v2167_v2 = vpop.permute.xlu1 %317  ;;  %v235_v8 = vadd.f32 %v231_v51, %v223_v56  ;;  %v236_v11 = vadd.f32 %v232_v5, %v224_v6  ;;  %v2275_v44 = vld [vmem:[%s2953_s7] sm:$0x3] }
  0xb9   :  { %v2004_v49 = vmov 31   ;;  %v414_v5 = vld [vmem:[#allocation2 + $0x1] ss:$8 sm:$0x3] }
  0xba   :  { %v2169_v9 = vadd.f32 %v241_v60, %v233_v62  ;;  %v2171_v10 = vadd.f32 %v242_v61, %v234_v63  ;;  %v2177_v14 = vadd.f32 %v243_v13, %v235_v8  ;;  %v2182_v16 = vadd.f32 %v244_v15, %v236_v11  ;;  %v266_v63 = vld [vmem:[#allocation2] ss:$8 sm:$0x3]  ;;  %v556_v15 = vld [vmem:[#allocation2 + $0x2] ss:$8 sm:$0x3] }
  0xbb   :  { %v2323_v61 = vand.u32 127, %v259_v23  ;;  %v2326_v62 = vsub.s32 1, %v2219_v26  ;;  %v2336_v6 = vrot.slane %v266_v63, %v2227_v28  ;;  %v2346_v13 = vrot.slane %v414_v5, %v2227_v28 }
  0xbc   :  { %251 = vrot.lane.b32.xlu1 %v2169_v9, %s1994_s28  ;;  %255 = vrot.lane.b32.xlu0 %v2171_v10, %s1994_s28  ;;  %v837_v29 = vrot.slane %v2171_v10, %v2227_v28  ;;  %v893_v34 = vrot.slane %v2171_v10, %v2236_v31  ;;  %v921_v40 = vrot.slane %v2171_v10, %v2249_v36  ;;  %v2262_v41 = vpop.permute.xlu0 %345 }
  0xbd   :  { %v2175_v57 = vpop.permute.xlu1 %373  ;;  %vm261_vm1 = vcmp.lt.s32.totalorder %v2323_v61, 17  ;;  %v2339_v8 = vrot.slane %v266_v63, %v2326_v62  ;;  %v861_v12 = vrot.slane %v2169_v9, %v2326_v62  ;;  %v2349_v11 = vrot.slane %v414_v5, %v2326_v62 }
  0xbe   :  { %v869_v23 = vrot.slane %v2177_v14, %v2326_v62  ;;  %v833_v26 = vrot.slane %v2169_v9, %v2227_v28  ;;  %vm408_vm2 = vcmp.lt.s32.totalorder %v2323_v61, 16  ;;  %vm550_vm3 = vcmp.lt.s32.totalorder %v2323_v61, 15 }
  0xbf   :  { %vm692_vm4 = vcmp.lt.s32.totalorder %v2323_v61, 1  ;;  %vm946_vm5 = vcmp.lt.s32.totalorder %v2323_v61, 127  ;;  %vm1088_vm6 = vcmp.lt.s32.totalorder %v2323_v61, 113  ;;  %vm1230_vm7 = vcmp.lt.s32.totalorder %v2323_v61, 112 }
  0xc0   :  { %253 = vrot.lane.b32.xlu1 %v2177_v14, %s1994_s28  ;;  %402 = vrot.lane.b32.xlu0 %v2177_v14, %s1960_s24  ;;  %vm1372_vm8 = vcmp.lt.s32.totalorder %v2323_v61, 111 }
  0xc1   :  { %v2280_v46 = vpop.permute.xlu0 %459 }
  0xc2   :  { %v2184_v17 = vpop.permute.xlu1 %431 }
  0xc4   :  { %257 = vrot.lane.b32.xlu1 %v2182_v16, %s1994_s28  ;;  %406 = vrot.lane.b32.xlu0 %v2182_v16, %s1960_s24 }
  0xc6   :  { %v2287_v47 = vpop.permute.xlu0 %573 }
  0xc7   :  { %v2189_v18 = vpop.permute.xlu1 %487 }
  0xc8   :  { %400 = vrot.lane.b32.xlu1 %v2169_v9, %s1960_s24  ;;  %542 = vrot.lane.b32.xlu0 %v2169_v9, %s1995_s29 }
  0xcb   :  { %v2293_v48 = vpop.permute.xlu0 %657 }
  0xcc   :  { %404 = vrot.lane.b32.xlu1 %v2171_v10, %s1960_s24  ;;  %546 = vrot.lane.b32.xlu0 %v2171_v10, %s1995_s29  ;;  %v2197_v19 = vpop.permute.xlu1 %515  ;;  %s1997_s24 = smov 127  }
  0xd0   :  { %544 = vrot.lane.b32.xlu1 %v2177_v14, %s1995_s29  ;;  %686 = vrot.lane.b32.xlu0 %v2177_v14, %s1996_s30  ;;  %v2296_v50 = vpop.permute.xlu0 %771 }
  0xd1   :  { %v2201_v20 = vpop.permute.xlu1 %601 }
  0xd4   :  { %548 = vrot.lane.b32.xlu1 %v2182_v16, %s1995_s29  ;;  %690 = vrot.lane.b32.xlu0 %v2182_v16, %s1996_s30 }
  0xd5   :  { %v856_v51 = vpop.permute.xlu0 %855 }
  0xd6   :  { %v2205_v21 = vpop.permute.xlu1 %629  ;;  %v2378_v63 = vmul.f32 %v861_v12, %v856_v51 }
  0xd8   :  { %684 = vrot.lane.b32.xlu1 %v2169_v9, %s1996_s30  ;;  %1253 = vperm.xlu0 %1824, %v2110_v7   ;;  %2976 = vst [vmem:[#allocation24_spill] sm:$0xff] %v2378_v63 }
  0xda   :  { %v2306_v53 = vpop.permute.xlu0 %969 }
  0xdb   :  { %v2209_v22 = vpop.permute.xlu1 %715 }
  0xdc   :  { %688 = vrot.lane.b32.xlu1 %v2171_v10, %s1996_s30  ;;  %942 = vrot.lane.b32.xlu0 %v2171_v10, %s1997_s24 }
  0xdd   :  { %1825 = vset.pattern.permute.xlu0 %v1998_v24  ;;  %v873_v24 = vrot.slane %v2182_v16, %v2326_v62 }
  0xdf   :  { %v2311_v56 = vpop.permute.xlu0 %997 }
  0xe0   :  { %938 = vrot.lane.b32.xlu1 %v2169_v9, %s1997_s24  ;;  %1084 = vrot.lane.b32.xlu0 %v2171_v10, %s1999_s11  ;;  %v2216_v25 = vpop.permute.xlu1 %743  ;;  %2971 = vst [vmem:[#allocation19_spill] sm:$0xff] %v2311_v56 }
  0xe4   :  { %940 = vrot.lane.b32.xlu1 %v2177_v14, %s1997_s24  ;;  %1226 = vrot.lane.b32.xlu0 %v2171_v10, %s2000_s12  ;;  %v2320_v60 = vpop.permute.xlu0 %1111 }
  0xe5   :  { %v2224_v27 = vpop.permute.xlu1 %799  ;;  %2973 = vst [vmem:[#allocation21_spill] sm:$0xff] %v2320_v60 }
  0xe8   :  { %944 = vrot.lane.b32.xlu1 %v2182_v16, %s1997_s24  ;;  %1281 = vperm.xlu0 %1825, %v2110_v7  }
  0xea   :  { %v2233_v30 = vpop.permute.xlu1 %827 }
  0xeb   :  { %v2239_v32 = vmul.f32 %v837_v29, %v2233_v30  ;;  %v841_v29 = vrot.slane %v2177_v14, %v2227_v28 }
  0xec   :  { %1080 = vrot.lane.b32.xlu1 %v2169_v9, %s1999_s11  ;;  %1828 = vset.pattern.permute.xlu0 %v2001_v33  ;;  %v889_v33 = vrot.slane %v2169_v9, %v2236_v31 }
  0xed   :  { %2966 = vst [vmem:[#allocation14_spill] sm:$0xff] %v2239_v32  ;;  %1395 = vperm.xlu0 %1828, %v2110_v7  }
  0xef   :  { %v2246_v35 = vpop.permute.xlu1 %883 }
  0xf0   :  { %v2254_v38 = vmul.f32 %v893_v34, %v2246_v35  ;;  %1082 = vrot.lane.b32.xlu1 %v2177_v14, %s1999_s11  ;;  %v897_v34 = vrot.slane %v2177_v14, %v2236_v31 }
  0xf1   :  { %1368 = vrot.lane.b32.xlu0 %v2171_v10, %s2002_s13 }
  0xf2   :  { %2967 = vst [vmem:[#allocation15_spill] sm:$0xff] %v2254_v38  ;;  %1829 = vset.pattern.permute.xlu0 %v2003_v39  ;;  %v901_v39 = vrot.slane %v2182_v16, %v2236_v31 }
  0xf4   :  { %v2264_v42 = vpop.permute.xlu1 %911  ;;  %1086 = vrot.lane.b32.xlu1 %v2182_v16, %s1999_s11  ;;  %v2418_v60 = vmul.f32 %v901_v39, %v2246_v35 }
  0xf5   :  { %v2269_v43 = vmul.f32 %v921_v40, %v2264_v42  ;;  %1423 = vperm.xlu0 %1829, %v2110_v7   ;;  %v698_v40 = vld [vmem:[#allocation2 + $0x3] ss:$8 sm:$0x3] }
  0xf6   :  { %v2397_v12 = vrot.slane %v698_v40, %v2326_v62 }
  0xf7   :  { %2968 = vst [vmem:[#allocation16_spill] sm:$0xff] %v2269_v43 }
  0xf8   :  { %1222 = vrot.lane.b32.xlu1 %v2169_v9, %s2000_s12 }
  0xf9   :  { %1832 = vset.pattern.permute.xlu0 %v1965_v1  ;;  %v2304_v52 = vpop.permute.xlu1 %1025 }
  0xfa   :  { %1514 = vperm.xlu0 %1832, %v2275_v44   ;;  %2969 = vst [vmem:[#allocation17_spill] sm:$0xff] %v2304_v52 }
  0xfc   :  { %1224 = vrot.lane.b32.xlu1 %v2177_v14, %s2000_s12 }
  0xfe   :  { %1835 = vset.pattern.permute.xlu0 %v1966_v3  ;;  %v2005_v3 = vmov 34   ;;  %v2309_v54 = vpop.permute.xlu1 %1053 }
  0xff   :  { %1575 = vperm.xlu0 %1835, %v2275_v44   ;;  %2970 = vst [vmem:[#allocation18_spill] sm:$0xff] %v2309_v54 }
 0x100   :  { %1228 = vrot.lane.b32.xlu1 %v2182_v16, %s2000_s12 }
 0x103   :  { %1837 = vset.pattern.permute.xlu0 %v1967_v4  ;;  %v2318_v55 = vpop.permute.xlu1 %1167 }
 0x104   :  { %1309 = vperm.xlu1 %1826, %v2110_v7   ;;  %2972 = vst [vmem:[#allocation20_spill] sm:$0xff] %v2318_v55 }
 0x108   :  { %1827 = vset.pattern.permute.xlu1 %v2004_v49  ;;  %v917_v49 = vrot.slane %v2169_v9, %v2249_v36 }
 0x109   :  { %1337 = vperm.xlu1 %1827, %v2110_v7  }
 0x10d   :  { %1364 = vrot.lane.b32.xlu1 %v2169_v9, %s2002_s13  ;;  %v2386_v9 = vrot.slane %v556_v15, %v2326_v62 }
 0x10e   :  { %1830 = vset.pattern.permute.xlu1 %v2005_v3  ;;  %v925_v3 = vrot.slane %v2177_v14, %v2249_v36 }
 0x111   :  { %1366 = vrot.lane.b32.xlu1 %v2177_v14, %s2002_s13  ;;  %v2388_v14 = vmul.f32 %v873_v24, %v856_v51  ;;  %v2410_v24 = vmul.f32 %v889_v33, %v2246_v35  ;;  %v1094_v33 = vld [vmem:[#allocation2 + $0x6] ss:$8 sm:$0x3] }
 0x112   :  { %v2447_v52 = vrot.slane %v1094_v33, %v2326_v62 }
 0x113   :  { %2979 = vst [vmem:[#allocation27_spill] sm:$0xff] %v2410_v24  ;;  %v2444_v24 = vrot.slane %v1094_v33, %v2227_v28 }
 0x114   :  { %2984 = vst [vmem:[#allocation32_spill] sm:$0xff] %v2447_v52 }
 0x115   :  { %1370 = vrot.lane.b32.xlu1 %v2182_v16, %s2002_s13  ;;  %2983 = vst [vmem:[#allocation31_spill] sm:$0xff] %v2444_v24 }
 0x119   :  { %1451 = vperm.xlu1 %1830, %v2110_v7  }
 0x11d   :  { %1831 = vset.pattern.permute.xlu1 %v2006_v58  ;;  %v929_v58 = vrot.slane %v2182_v16, %v2249_v36 }
 0x11e   :  { %1479 = vperm.xlu1 %1831, %v2110_v7   ;;  %v2330_v7 = vpop.permute.xlu1 %1195 }
 0x11f   :  { %2974 = vst [vmem:[#allocation22_spill] sm:$0xff] %v2330_v7  ;;  %v2382_v7 = vmul.f32 %v869_v23, %v856_v51  ;;  %v2400_v23 = vmul.f32 %v841_v29, %v2233_v30  ;;  %v2437_v43 = vmul.f32 %v929_v58, %v2264_v42 }
 0x121   :  { %2982 = vst [vmem:[#allocation30_spill] sm:$0xff] %v2437_v43 }
 0x122   :  { %1833 = vset.pattern.permute.xlu1 %v1965_v1  ;;  %v2332_v1 = vpop.permute.xlu0 %1139 }
 0x123   :  { %1539 = vperm.xlu1 %1833, %v1511_v59   ;;  %2975 = vst [vmem:[#allocation23_spill] sm:$0xff] %v2332_v1  ;;  %v2376_v59 = vrot.slane %v556_v15, %v2227_v28  ;;  %v2394_v1 = vrot.slane %v698_v40, %v2227_v28 }
 0x127   :  { %1834 = vset.pattern.permute.xlu1 %v1964_v0  ;;  %v865_v0 = vrot.slane %v2171_v10, %v2326_v62  ;;  %v845_v10 = vrot.slane %v2182_v16, %v2227_v28 }
 0x128   :  { %1547 = vperm.xlu1 %1834, %v2275_v44  }
 0x129   :  { %v2380_v5 = vmul.f32 %v865_v0, %v856_v51  ;;  %v952_v0 = vld [vmem:[#allocation2 + $0x5] ss:$8 sm:$0x3] }
 0x12b   :  { %2977 = vst [vmem:[#allocation25_spill] sm:$0xff] %v2380_v5 }
 0x12c   :  { %1836 = vset.pattern.permute.xlu1 %v1967_v4  ;;  %v2391_v4 = vmul.f32 %v833_v26, %v2233_v30  ;;  %v2413_v26 = vmul.f32 %v897_v34, %v2246_v35 }
 0x12d   :  { %1603 = vperm.xlu1 %1836, %v2275_v44   ;;  %v2403_v44 = vmul.f32 %v845_v10, %v2233_v30  ;;  %v2421_v30 = vmul.f32 %v917_v49, %v2264_v42  ;;  %v2424_v10 = vrot.slane %v952_v0, %v2227_v28  ;;  %v2434_v49 = vmul.f32 %v925_v3, %v2264_v42 }
 0x12e   :  { %2978 = vst [vmem:[#allocation26_spill] sm:$0xff] %v2391_v4  ;;  %v252_v16 = vpop.permute.xlu1 %251  ;;  %v256_v55 = vpop.permute.xlu0 %255 }
 0x12f   :  { %v262_v51 = vsel %vm261_vm1, %v252_v16, %v256_v55  ;;  %v264_v15 = vsel %vm261_vm1, %v256_v55, %v252_v16  ;;  %2980 = vst [vmem:[#allocation28_spill] sm:$0xff] %v2421_v30  ;;  %v2427_v55 = vrot.slane %v952_v0, %v2326_v62  ;;  %2981 = vst [vmem:[#allocation29_spill] sm:$0xff] %v2434_v49 }
 0x130   :  { %v278_v40 = vmul.f32 %v2336_v6, %v264_v15  ;;  %v279_v29 = vmul.f32 %v2339_v8, %v262_v51 }
 0x132   :  { %v290_v34 = vrot.slane %v278_v40, %v2227_v28  ;;  %v294_v16 = vrot.slane %v279_v29, %v2227_v28  ;;  %v323_v15 = vrot.slane %v278_v40, %v2326_v62  ;;  %v327_v51 = vrot.slane %v279_v29, %v2326_v62  ;;  %v254_v35 = vpop.permute.xlu1 %253  ;;  %v403_v39 = vpop.permute.xlu0 %402 }
 0x133   :  { %v351_v0 = vrot.slane %v278_v40, %v2236_v31  ;;  %v355_v30 = vrot.slane %v279_v29, %v2236_v31  ;;  %v379_v42 = vrot.slane %v278_v40, %v2249_v36  ;;  %v383_v58 = vrot.slane %v279_v29, %v2249_v36 }
 0x134   :  { %v303_v54 = vmul.f32 %v290_v34, %v2251_v37  ;;  %v304_v38 = vmul.f32 %v294_v16, %v2251_v37  ;;  %v336_v3 = vmul.f32 %v323_v15, %v2167_v2  ;;  %v337_v56 = vmul.f32 %v327_v51, %v2167_v2 }
 0x135   :  { %v364_v16 = vmul.f32 %v351_v0, %v2262_v41  ;;  %v365_v63 = vmul.f32 %v355_v30, %v2262_v41  ;;  %v392_v0 = vmul.f32 %v379_v42, %v2175_v57  ;;  %v393_v52 = vmul.f32 %v383_v58, %v2175_v57 }
 0x136   :  { %v312_v5 = vadd.f32 %v2165_v45, %v303_v54  ;;  %v313_v34 = vadd.f32 %v2165_v45, %v304_v38  ;;  %v258_v24 = vpop.permute.xlu1 %257  ;;  %v407_v43 = vpop.permute.xlu0 %406 }
 0x137   :  { %v263_v33 = vsel %vm261_vm1, %v254_v35, %v258_v24  ;;  %v265_v15 = vsel %vm261_vm1, %v258_v24, %v254_v35  ;;  %v410_v40 = vsel %vm408_vm2, %v403_v39, %v407_v43  ;;  %v412_v54 = vsel %vm408_vm2, %v407_v43, %v403_v39 }
 0x138   :  { %v340_v29 = vadd.f32 %v336_v3, %v312_v5  ;;  %v341_v38 = vadd.f32 %v337_v56, %v313_v34  ;;  %v280_v51 = vmul.f32 %v2336_v6, %v265_v15  ;;  %v281_v30 = vmul.f32 %v2339_v8, %v263_v33 }
 0x139   :  { %v428_v49 = vmul.f32 %v2346_v13, %v412_v54  ;;  %v429_v24 = vmul.f32 %v2349_v11, %v410_v40 }
 0x13a   :  { %v368_v35 = vadd.f32 %v364_v16, %v340_v29  ;;  %v369_v32 = vadd.f32 %v365_v63, %v341_v38  ;;  %v298_v4 = vrot.slane %v280_v51, %v2227_v28  ;;  %v302_v43 = vrot.slane %v281_v30, %v2227_v28  ;;  %v401_v5 = vpop.permute.xlu1 %400  ;;  %v543_v40 = vpop.permute.xlu0 %542 }
 0x13b   :  { %v331_v56 = vrot.slane %v280_v51, %v2326_v62  ;;  %v335_v6 = vrot.slane %v281_v30, %v2326_v62  ;;  %v359_v8 = vrot.slane %v280_v51, %v2236_v31  ;;  %v363_v39 = vrot.slane %v281_v30, %v2236_v31 }
 0x13c   :  { %v2478_v3 = vadd.f32 %v392_v0, %v368_v35  ;;  %v2480_v42 = vadd.f32 %v393_v52, %v369_v32  ;;  %v305_v63 = vmul.f32 %v298_v4, %v2251_v37  ;;  %v306_v58 = vmul.f32 %v302_v43, %v2251_v37 }
 0x13d   :  { %v338_v34 = vmul.f32 %v331_v56, %v2167_v2  ;;  %v339_v16 = vmul.f32 %v335_v6, %v2167_v2  ;;  %v366_v33 = vmul.f32 %v359_v8, %v2262_v41  ;;  %v367_v15 = vmul.f32 %v363_v39, %v2262_v41 }
 0x13e   :  { %v314_v54 = vadd.f32 %v2165_v45, %v305_v63  ;;  %v315_v29 = vadd.f32 %v2165_v45, %v306_v58  ;;  %v387_v32 = vrot.slane %v280_v51, %v2249_v36  ;;  %v391_v52 = vrot.slane %v281_v30, %v2249_v36  ;;  %v405_v4 = vpop.permute.xlu1 %404 }
 0x13f   :  { %v445_v37 = vrot.slane %v428_v49, %v2227_v28  ;;  %v449_v38 = vrot.slane %v429_v24, %v2227_v28  ;;  %v473_v2 = vrot.slane %v428_v49, %v2326_v62  ;;  %v477_v0 = vrot.slane %v429_v24, %v2326_v62 }
 0x140   :  { %v342_v35 = vadd.f32 %v338_v34, %v314_v54  ;;  %v343_v41 = vadd.f32 %v339_v16, %v315_v29  ;;  %v394_v43 = vmul.f32 %v387_v32, %v2175_v57  ;;  %v395_v56 = vmul.f32 %v391_v52, %v2175_v57  ;;  %v547_v32 = vpop.permute.xlu0 %546 }
 0x141   :  { %v452_v45 = vmul.f32 %v445_v37, %v2184_v17  ;;  %v453_v51 = vmul.f32 %v449_v38, %v2184_v17  ;;  %v480_v30 = vmul.f32 %v473_v2, %v2280_v46  ;;  %v481_v6 = vmul.f32 %v477_v0, %v2280_v46 }
 0x142   :  { %v370_v8 = vadd.f32 %v366_v33, %v342_v35  ;;  %v371_v39 = vadd.f32 %v367_v15, %v343_v41  ;;  %v501_v63 = vrot.slane %v428_v49, %v2236_v31  ;;  %v505_v58 = vrot.slane %v429_v24, %v2236_v31  ;;  %v2504_v34 = vpop.permute.xlu1 %544 }
 0x143   :  { %v529_v16 = vrot.slane %v428_v49, %v2249_v36  ;;  %v533_v57 = vrot.slane %v429_v24, %v2249_v36  ;;  %v409_v54 = vsel %vm408_vm2, %v401_v5, %v405_v4  ;;  %v411_v29 = vsel %vm408_vm2, %v405_v4, %v401_v5 }
 0x144   :  { %v398_v52 = vadd.f32 %v394_v43, %v370_v8  ;;  %v399_v33 = vadd.f32 %v395_v56, %v371_v39  ;;  %v508_v15 = vmul.f32 %v501_v63, %v2189_v18  ;;  %v509_v37 = vmul.f32 %v505_v58, %v2189_v18 }
 0x145   :  { %v536_v38 = vmul.f32 %v529_v16, %v2197_v19  ;;  %v537_v2 = vmul.f32 %v533_v57, %v2197_v19  ;;  %v426_v49 = vmul.f32 %v2346_v13, %v411_v29  ;;  %v427_v24 = vmul.f32 %v2349_v11, %v409_v54 }
 0x146   :  { %v456_v0 = vadd.f32 %v452_v45, %v398_v52  ;;  %v457_v35 = vadd.f32 %v453_v51, %v399_v33  ;;  %v551_v5 = vsel %vm550_vm3, %v543_v40, %v547_v32  ;;  %v553_v4 = vsel %vm550_vm3, %v547_v32, %v543_v40  ;;  %v549_v41 = vpop.permute.xlu1 %548 }
 0x147   :  { %v437_v43 = vrot.slane %v426_v49, %v2227_v28  ;;  %v441_v56 = vrot.slane %v427_v24, %v2227_v28  ;;  %v465_v8 = vrot.slane %v426_v49, %v2326_v62  ;;  %v469_v39 = vrot.slane %v427_v24, %v2326_v62 }
 0x148   :  { %v484_v13 = vadd.f32 %v480_v30, %v456_v0  ;;  %v485_v63 = vadd.f32 %v481_v6, %v457_v35  ;;  %v493_v11 = vrot.slane %v426_v49, %v2236_v31  ;;  %v497_v45 = vrot.slane %v427_v24, %v2236_v31  ;;  %v687_v0 = vpop.permute.xlu0 %686 }
 0x149   :  { %v450_v51 = vmul.f32 %v437_v43, %v2184_v17  ;;  %v451_v58 = vmul.f32 %v441_v56, %v2184_v17  ;;  %v478_v40 = vmul.f32 %v465_v8, %v2280_v46  ;;  %v479_v16 = vmul.f32 %v469_v39, %v2280_v46 }
 0x14a   :  { %v512_v57 = vadd.f32 %v508_v15, %v484_v13  ;;  %v513_v54 = vadd.f32 %v509_v37, %v485_v63  ;;  %v506_v29 = vmul.f32 %v493_v11, %v2189_v18  ;;  %v507_v30 = vmul.f32 %v497_v45, %v2189_v18  ;;  %v2535_v6 = vpop.permute.xlu1 %684 }
 0x14b   :  { %v454_v32 = vadd.f32 %v450_v51, %v2478_v3  ;;  %v455_v52 = vadd.f32 %v451_v58, %v2480_v42  ;;  %v521_v17 = vrot.slane %v426_v49, %v2249_v36  ;;  %v525_v33 = vrot.slane %v427_v24, %v2249_v36 }
 0x14c   :  { %v540_v46 = vadd.f32 %v536_v38, %v512_v57  ;;  %v541_v35 = vadd.f32 %v537_v2, %v513_v54  ;;  %v568_v15 = vmul.f32 %v2376_v59, %v553_v4  ;;  %v569_v37 = vmul.f32 %v2386_v9, %v551_v5 }
 0x14d   :  { %v482_v43 = vadd.f32 %v478_v40, %v454_v32  ;;  %v483_v56 = vadd.f32 %v479_v16, %v455_v52  ;;  %v534_v18 = vmul.f32 %v521_v17, %v2197_v19  ;;  %v535_v8 = vmul.f32 %v525_v33, %v2197_v19  ;;  %v691_v16 = vpop.permute.xlu0 %690 }
 0x14e   :  { %v579_v3 = vrot.slane %v568_v15, %v2227_v28  ;;  %v583_v42 = vrot.slane %v569_v37, %v2227_v28  ;;  %v607_v49 = vrot.slane %v568_v15, %v2326_v62  ;;  %v611_v24 = vrot.slane %v569_v37, %v2326_v62  ;;  %v689_v38 = vpop.permute.xlu1 %688 }
 0x14f   :  { %v510_v2 = vadd.f32 %v506_v29, %v482_v43  ;;  %v511_v39 = vadd.f32 %v507_v30, %v483_v56  ;;  %v635_v4 = vrot.slane %v568_v15, %v2236_v31  ;;  %v639_v5 = vrot.slane %v569_v37, %v2236_v31 }
 0x150   :  { %v592_v13 = vmul.f32 %v579_v3, %v2287_v47  ;;  %v593_v63 = vmul.f32 %v583_v42, %v2287_v47  ;;  %v620_v19 = vmul.f32 %v607_v49, %v2201_v20  ;;  %v621_v11 = vmul.f32 %v611_v24, %v2201_v20 }
 0x151   :  { %v538_v45 = vadd.f32 %v534_v18, %v510_v2  ;;  %v539_v51 = vadd.f32 %v535_v8, %v511_v39  ;;  %v648_v58 = vmul.f32 %v635_v4, %v2205_v21  ;;  %v649_v40 = vmul.f32 %v639_v5, %v2205_v21 }
 0x152   :  { %v663_v57 = vrot.slane %v568_v15, %v2249_v36  ;;  %v667_v54 = vrot.slane %v569_v37, %v2249_v36  ;;  %v552_v29 = vsel %vm550_vm3, %v2504_v34, %v549_v41  ;;  %v554_v30 = vsel %vm550_vm3, %v549_v41, %v2504_v34  ;;  %v2565_v32 = vpop.permute.xlu1 %938 }
 0x153   :  { %v596_v52 = vadd.f32 %v592_v13, %v538_v45  ;;  %v597_v17 = vadd.f32 %v593_v63, %v539_v51  ;;  %v570_v33 = vmul.f32 %v2376_v59, %v554_v30  ;;  %v571_v43 = vmul.f32 %v2386_v9, %v552_v29 }
 0x154   :  { %v676_v15 = vmul.f32 %v663_v57, %v2293_v48  ;;  %v677_v37 = vmul.f32 %v667_v54, %v2293_v48  ;;  %v694_v56 = vsel %vm692_vm4, %v687_v0, %v691_v16  ;;  %v696_v18 = vsel %vm692_vm4, %v691_v16, %v687_v0 }
 0x155   :  { %v624_v8 = vadd.f32 %v620_v19, %v596_v52  ;;  %v625_v34 = vadd.f32 %v621_v11, %v597_v17  ;;  %v587_v41 = vrot.slane %v570_v33, %v2227_v28  ;;  %v591_v3 = vrot.slane %v571_v43, %v2227_v28 }
 0x156   :  { %v615_v59 = vrot.slane %v570_v33, %v2326_v62  ;;  %v619_v9 = vrot.slane %v571_v43, %v2326_v62  ;;  %v643_v42 = vrot.slane %v570_v33, %v2236_v31  ;;  %v647_v49 = vrot.slane %v571_v43, %v2236_v31  ;;  %v941_v24 = vpop.permute.xlu1 %940 }
 0x157   :  { %v652_v2 = vadd.f32 %v648_v58, %v624_v8  ;;  %v653_v39 = vadd.f32 %v649_v40, %v625_v34  ;;  %v594_v4 = vmul.f32 %v587_v41, %v2287_v47  ;;  %v595_v0 = vmul.f32 %v591_v3, %v2287_v47 }
 0x158   :  { %v622_v5 = vmul.f32 %v615_v59, %v2201_v20  ;;  %v623_v13 = vmul.f32 %v619_v9, %v2201_v20  ;;  %v650_v63 = vmul.f32 %v643_v42, %v2205_v21  ;;  %v651_v19 = vmul.f32 %v647_v49, %v2205_v21 }
 0x159   :  { %v680_v11 = vadd.f32 %v676_v15, %v652_v2  ;;  %v681_v45 = vadd.f32 %v677_v37, %v653_v39  ;;  %v598_v51 = vadd.f32 %v594_v4, %v540_v46  ;;  %v599_v16 = vadd.f32 %v595_v0, %v541_v35 }
 0x15a   :  { %v671_v58 = vrot.slane %v570_v33, %v2249_v36  ;;  %v675_v40 = vrot.slane %v571_v43, %v2249_v36  ;;  %v712_v47 = vmul.f32 %v2394_v1, %v696_v18  ;;  %v713_v57 = vmul.f32 %v2397_v12, %v694_v56  ;;  %v945_v46 = vpop.permute.xlu1 %944 }
 0x15b   :  { %v626_v54 = vadd.f32 %v622_v5, %v598_v51  ;;  %v627_v29 = vadd.f32 %v623_v13, %v599_v16  ;;  %v693_v20 = vsel %vm692_vm4, %v2535_v6, %v689_v38  ;;  %v695_v21 = vsel %vm692_vm4, %v689_v38, %v2535_v6 }
 0x15c   :  { %v678_v35 = vmul.f32 %v671_v58, %v2293_v48  ;;  %v679_v30 = vmul.f32 %v675_v40, %v2293_v48  ;;  %v729_v52 = vrot.slane %v712_v47, %v2227_v28  ;;  %v733_v17 = vrot.slane %v713_v57, %v2227_v28 }
 0x15d   :  { %v654_v33 = vadd.f32 %v650_v63, %v626_v54  ;;  %v655_v43 = vadd.f32 %v651_v19, %v627_v29  ;;  %v757_v15 = vrot.slane %v712_v47, %v2326_v62  ;;  %v761_v37 = vrot.slane %v713_v57, %v2326_v62 }
 0x15e   :  { %v736_v56 = vmul.f32 %v729_v52, %v2209_v22  ;;  %v737_v18 = vmul.f32 %v733_v17, %v2209_v22  ;;  %v785_v6 = vrot.slane %v712_v47, %v2236_v31  ;;  %v789_v38 = vrot.slane %v713_v57, %v2236_v31  ;;  %v2616_v0 = vpop.permute.xlu1 %1080 }
 0x15f   :  { %v682_v8 = vadd.f32 %v678_v35, %v654_v33  ;;  %v683_v48 = vadd.f32 %v679_v30, %v655_v43  ;;  %v764_v34 = vmul.f32 %v757_v15, %v2216_v25  ;;  %v765_v41 = vmul.f32 %v761_v37, %v2216_v25 }
 0x160   :  { %v792_v3 = vmul.f32 %v785_v6, %v2296_v50  ;;  %v793_v59 = vmul.f32 %v789_v38, %v2296_v50  ;;  %v813_v9 = vrot.slane %v712_v47, %v2249_v36  ;;  %v817_v42 = vrot.slane %v713_v57, %v2249_v36 }
 0x161   :  { %v740_v49 = vadd.f32 %v736_v56, %v682_v8  ;;  %v741_v2 = vadd.f32 %v737_v18, %v683_v48  ;;  %v710_v39 = vmul.f32 %v2394_v1, %v695_v21  ;;  %v711_v4 = vmul.f32 %v2397_v12, %v693_v20  ;;  %v2640_v18 = vpop.permute.xlu0 %1253 }
 0x162   :  { %v820_v5 = vmul.f32 %v813_v9, %v2224_v27  ;;  %v821_v13 = vmul.f32 %v817_v42, %v2224_v27  ;;  %v948_v63 = vsel %vm946_vm5, %v941_v24, %v945_v46  ;;  %v950_v19 = vsel %vm946_vm5, %v945_v46, %v941_v24  ;;  %v2636_v15 = vpop.permute.xlu1 %1082 }
 0x163   :  { %v768_v51 = vadd.f32 %v764_v34, %v740_v49  ;;  %v769_v16 = vadd.f32 %v765_v41, %v741_v2  ;;  %v721_v58 = vrot.slane %v710_v39, %v2227_v28  ;;  %v725_v1 = vrot.slane %v711_v4, %v2227_v28 }
 0x164   :  { %v749_v12 = vrot.slane %v710_v39, %v2326_v62  ;;  %v753_v40 = vrot.slane %v711_v4, %v2326_v62  ;;  %v777_v47 = vrot.slane %v710_v39, %v2236_v31  ;;  %v781_v57 = vrot.slane %v711_v4, %v2236_v31 }
 0x165   :  { %v796_v54 = vadd.f32 %v792_v3, %v768_v51  ;;  %v797_v29 = vadd.f32 %v793_v59, %v769_v16  ;;  %v734_v20 = vmul.f32 %v721_v58, %v2209_v22  ;;  %v735_v24 = vmul.f32 %v725_v1, %v2209_v22  ;;  %v943_v16 = vpop.permute.xlu0 %942  ;;  %v2985_v58 = vld [vmem:[#allocation26_spill] sm:$0xff] }
 0x166   :  { %v762_v21 = vmul.f32 %v749_v12, %v2216_v25  ;;  %v763_v46 = vmul.f32 %v753_v40, %v2216_v25  ;;  %v790_v35 = vmul.f32 %v777_v47, %v2296_v50  ;;  %v791_v30 = vmul.f32 %v781_v57, %v2296_v50  ;;  %v2986_v12 = vld [vmem:[#allocation14_spill] sm:$0xff]  ;;  %v2987_v47 = vld [vmem:[#allocation29_spill] sm:$0xff] }
 0x167   :  { %v824_v52 = vadd.f32 %v820_v5, %v796_v54  ;;  %v825_v17 = vadd.f32 %v821_v13, %v797_v29  ;;  %v738_v33 = vadd.f32 %v734_v20, %v680_v11  ;;  %v739_v43 = vadd.f32 %v735_v24, %v681_v45  ;;  %v1236_v11 = vld [vmem:[#allocation2 + $0x7] ss:$8 sm:$0x3]  ;;  %v1378_v5 = vld [vmem:[#allocation2 + $0x10] ss:$8 sm:$0x3] }
 0x168   :  { %v805_v37 = vrot.slane %v710_v39, %v2249_v36  ;;  %v809_v56 = vrot.slane %v711_v4, %v2249_v36  ;;  %v966_v22 = vmul.f32 %v2424_v10, %v948_v63  ;;  %v967_v25 = vmul.f32 %v2427_v55, %v950_v19  ;;  %v2663_v4 = vpop.permute.xlu1 %1086  ;;  %v2988_v57 = vld [vmem:[#allocation30_spill] sm:$0xff] }
 0x169   :  { %v852_v6 = vadd.f32 %v2400_v23, %v824_v52  ;;  %v853_v50 = vadd.f32 %v2403_v44, %v825_v17  ;;  %v766_v38 = vadd.f32 %v762_v21, %v738_v33  ;;  %v767_v8 = vadd.f32 %v763_v46, %v739_v43  ;;  %v2989_v21 = vld [vmem:[#allocation24_spill] sm:$0xff]  ;;  %v2991_v33 = vld [vmem:[#allocation19_spill] sm:$0xff] }
 0x16a   :  { %v818_v45 = vmul.f32 %v805_v37, %v2224_v27  ;;  %v819_v48 = vmul.f32 %v809_v56, %v2224_v27  ;;  %v983_v34 = vrot.slane %v966_v22, %v2227_v28  ;;  %v987_v41 = vrot.slane %v967_v25, %v2227_v28 }
 0x16b   :  { %v880_v3 = vadd.f32 %v2382_v7, %v852_v6  ;;  %v881_v59 = vadd.f32 %v2388_v14, %v853_v50  ;;  %v794_v9 = vadd.f32 %v790_v35, %v766_v38  ;;  %v795_v42 = vadd.f32 %v791_v30, %v767_v8  ;;  %v2990_v35 = vld [vmem:[#allocation25_spill] sm:$0xff]  ;;  %v2993_v38 = vld [vmem:[#allocation27_spill] sm:$0xff] }
 0x16c   :  { %v990_v23 = vmul.f32 %v983_v34, %v2306_v53  ;;  %v991_v44 = vmul.f32 %v987_v41, %v2306_v53  ;;  %v2656_v49 = vrot.slane %v1236_v11, %v2227_v28  ;;  %v2659_v27 = vrot.slane %v1236_v11, %v2326_v62  ;;  %v2994_v11 = vld [vmem:[#allocation15_spill] sm:$0xff] }
 0x16d   :  { %v822_v2 = vadd.f32 %v818_v45, %v794_v9  ;;  %v823_v39 = vadd.f32 %v819_v48, %v795_v42  ;;  %v908_v7 = vadd.f32 %v2413_v26, %v880_v3  ;;  %v909_v14 = vadd.f32 %v2418_v60, %v881_v59  ;;  %v2695_v48 = vpop.permute.xlu1 %1222  ;;  %v1085_v9 = vpop.permute.xlu0 %1084  ;;  %v2995_v42 = vld [vmem:[#allocation18_spill] sm:$0xff] }
 0x16e   :  { %v1011_v13 = vrot.slane %v966_v22, %v2326_v62  ;;  %v1015_v63 = vrot.slane %v967_v25, %v2326_v62  ;;  %v1039_v19 = vrot.slane %v966_v22, %v2236_v31  ;;  %v1043_v51 = vrot.slane %v967_v25, %v2236_v31 }
 0x16f   :  { %v850_v1 = vadd.f32 %v2985_v58, %v822_v2  ;;  %v851_v40 = vadd.f32 %v2986_v12, %v823_v39  ;;  %v936_v26 = vadd.f32 %v2987_v47, %v908_v7  ;;  %v937_v60 = vadd.f32 %v2988_v57, %v909_v14  ;;  %v2997_v39 = vld [vmem:[#allocation16_spill] sm:$0xff] }
 0x170   :  { %v1067_v54 = vrot.slane %v966_v22, %v2249_v36  ;;  %v1071_v29 = vrot.slane %v967_v25, %v2249_v36  ;;  %v2676_v20 = vrot.slane %v1378_v5, %v2227_v28  ;;  %v2679_v24 = vrot.slane %v1378_v5, %v2326_v62  ;;  %v2992_v25 = vld [vmem:[#allocation17_spill] sm:$0xff] }
 0x171   :  { %v878_v46 = vadd.f32 %v2989_v21, %v850_v1  ;;  %v879_v30 = vadd.f32 %v2990_v35, %v851_v40  ;;  %v994_v52 = vadd.f32 %v990_v23, %v936_v26  ;;  %v995_v17 = vadd.f32 %v991_v44, %v937_v60  ;;  %v2996_v44 = vld [vmem:[#allocation28_spill] sm:$0xff]  ;;  %v2722_v60 = vpop.permute.xlu1 %1224 }
 0x172   :  { %v1018_v43 = vmul.f32 %v1011_v13, %v2991_v33  ;;  %v1019_v37 = vmul.f32 %v1015_v63, %v2991_v33  ;;  %v947_v56 = vsel %vm946_vm5, %v2565_v32, %v943_v16  ;;  %v949_v22 = vsel %vm946_vm5, %v943_v16, %v2565_v32 }
 0x173   :  { %v1046_v6 = vmul.f32 %v1039_v19, %v2992_v25  ;;  %v1047_v50 = vmul.f32 %v1043_v51, %v2992_v25  ;;  %v906_v8 = vadd.f32 %v2993_v38, %v878_v46  ;;  %v907_v45 = vadd.f32 %v2994_v11, %v879_v30  ;;  %v2999_v46 = vld [vmem:[#allocation32_spill] sm:$0xff] }
 0x174   :  { %v1022_v34 = vadd.f32 %v1018_v43, %v994_v52  ;;  %v1023_v41 = vadd.f32 %v1019_v37, %v995_v17  ;;  %v964_v3 = vmul.f32 %v2424_v10, %v947_v56  ;;  %v965_v59 = vmul.f32 %v2427_v55, %v949_v22 }
 0x175   :  { %v1074_v23 = vmul.f32 %v1067_v54, %v2995_v42  ;;  %v1075_v32 = vmul.f32 %v1071_v29, %v2995_v42  ;;  %v934_v2 = vadd.f32 %v2996_v44, %v906_v8  ;;  %v935_v7 = vadd.f32 %v2997_v39, %v907_v45  ;;  %v2998_v29 = vld [vmem:[#allocation31_spill] sm:$0xff] }
 0x176   :  { %v975_v14 = vrot.slane %v964_v3, %v2227_v28  ;;  %v979_v5 = vrot.slane %v965_v59, %v2227_v28  ;;  %v1003_v13 = vrot.slane %v964_v3, %v2326_v62  ;;  %v1007_v63 = vrot.slane %v965_v59, %v2326_v62  ;;  %v3001_v39 = vld [vmem:[#allocation23_spill] sm:$0xff] }
 0x177   :  { %v1031_v10 = vrot.slane %v964_v3, %v2236_v31  ;;  %v1035_v55 = vrot.slane %v965_v59, %v2236_v31  ;;  %v1089_v19 = vsel %vm1088_vm6, %v2616_v0, %v1085_v9  ;;  %v1091_v51 = vsel %vm1088_vm6, %v1085_v9, %v2616_v0 }
 0x178   :  { %v1050_v16 = vadd.f32 %v1046_v6, %v1022_v34  ;;  %v1051_v58 = vadd.f32 %v1047_v50, %v1023_v41  ;;  %v988_v1 = vmul.f32 %v975_v14, %v2306_v53  ;;  %v989_v12 = vmul.f32 %v979_v5, %v2306_v53  ;;  %v3002_v5 = vld [vmem:[#allocation20_spill] sm:$0xff] }
 0x179   :  { %v1016_v40 = vmul.f32 %v1003_v13, %v2991_v33  ;;  %v1017_v47 = vmul.f32 %v1007_v63, %v2991_v33  ;;  %v1059_v26 = vrot.slane %v964_v3, %v2249_v36  ;;  %v1063_v57 = vrot.slane %v965_v59, %v2249_v36  ;;  %v3000_v3 = vld [vmem:[#allocation21_spill] sm:$0xff] }
 0x17a   :  { %v992_v54 = vadd.f32 %v988_v1, %v934_v2  ;;  %v993_v0 = vadd.f32 %v989_v12, %v935_v7  ;;  %v2725_v21 = vmul.f32 %v2998_v29, %v1089_v19  ;;  %v2728_v35 = vmul.f32 %v2999_v46, %v1091_v51  ;;  %v1227_v19 = vpop.permute.xlu0 %1226 }
 0x17b   :  { %v1044_v53 = vmul.f32 %v1031_v10, %v2992_v25  ;;  %v1045_v30 = vmul.f32 %v1035_v55, %v2992_v25  ;;  %v1072_v52 = vmul.f32 %v1059_v26, %v2995_v42  ;;  %v1073_v17 = vmul.f32 %v1063_v57, %v2995_v42  ;;  %v1229_v42 = vpop.permute.xlu1 %1228 }
 0x17c   :  { %v1020_v33 = vadd.f32 %v1016_v40, %v992_v54  ;;  %v1021_v43 = vadd.f32 %v1017_v47, %v993_v0  ;;  %v1117_v37 = vrot.slane %v2725_v21, %v2227_v28  ;;  %v1121_v56 = vrot.slane %v2728_v35, %v2227_v28 }
 0x17d   :  { %v1145_v22 = vrot.slane %v2725_v21, %v2326_v62  ;;  %v1149_v6 = vrot.slane %v2728_v35, %v2326_v62  ;;  %v1173_v25 = vrot.slane %v2725_v21, %v2236_v31  ;;  %v1177_v50 = vrot.slane %v2728_v35, %v2236_v31 }
 0x17e   :  { %v1048_v38 = vadd.f32 %v1044_v53, %v1020_v33  ;;  %v1049_v8 = vadd.f32 %v1045_v30, %v1021_v43  ;;  %v1090_v11 = vsel %vm1088_vm6, %v2636_v15, %v2663_v4  ;;  %v1092_v45 = vsel %vm1088_vm6, %v2663_v4, %v2636_v15 }
 0x17f   :  { %v1078_v34 = vadd.f32 %v1074_v23, %v1050_v16  ;;  %v1079_v41 = vadd.f32 %v1075_v32, %v1051_v58  ;;  %v1130_v59 = vmul.f32 %v1117_v37, %v3000_v3  ;;  %v1131_v9 = vmul.f32 %v1121_v56, %v3000_v3 }
 0x180   :  { %v1076_v44 = vadd.f32 %v1072_v52, %v1048_v38  ;;  %v1077_v2 = vadd.f32 %v1073_v17, %v1049_v8  ;;  %v1158_v7 = vmul.f32 %v1145_v22, %v3001_v39  ;;  %v1159_v14 = vmul.f32 %v1149_v6, %v3001_v39 }
 0x181   :  { %v1186_v13 = vmul.f32 %v1173_v25, %v3002_v5  ;;  %v1187_v63 = vmul.f32 %v1177_v50, %v3002_v5  ;;  %v1108_v10 = vmul.f32 %v2998_v29, %v1090_v11  ;;  %v1109_v15 = vmul.f32 %v2999_v46, %v1092_v45  ;;  %v3003_v11 = vld [vmem:[#allocation22_spill] sm:$0xff] }
 0x182   :  { %v1134_v4 = vadd.f32 %v1130_v59, %v1076_v44  ;;  %v1135_v23 = vadd.f32 %v1131_v9, %v1077_v2  ;;  %v1201_v32 = vrot.slane %v2725_v21, %v2249_v36  ;;  %v1205_v55 = vrot.slane %v2728_v35, %v2249_v36 }
 0x183   :  { %v1125_v51 = vrot.slane %v1108_v10, %v2227_v28  ;;  %v1129_v16 = vrot.slane %v1109_v15, %v2227_v28  ;;  %v1153_v58 = vrot.slane %v1108_v10, %v2326_v62  ;;  %v1157_v1 = vrot.slane %v1109_v15, %v2326_v62  ;;  %v2770_v12 = vpop.permute.xlu1 %1309 }
 0x184   :  { %v1162_v40 = vadd.f32 %v1158_v7, %v1134_v4  ;;  %v1163_v47 = vadd.f32 %v1159_v14, %v1135_v23  ;;  %v1231_v26 = vsel %vm1230_vm7, %v2695_v48, %v1227_v19  ;;  %v1233_v57 = vsel %vm1230_vm7, %v1227_v19, %v2695_v48 }
 0x185   :  { %v1132_v54 = vmul.f32 %v1125_v51, %v3000_v3  ;;  %v1133_v0 = vmul.f32 %v1129_v16, %v3000_v3  ;;  %v1181_v29 = vrot.slane %v1108_v10, %v2236_v31  ;;  %v1185_v21 = vrot.slane %v1109_v15, %v2236_v31 }
 0x186   :  { %v1190_v46 = vadd.f32 %v1186_v13, %v1162_v40  ;;  %v1191_v35 = vadd.f32 %v1187_v63, %v1163_v47  ;;  %v1160_v53 = vmul.f32 %v1153_v58, %v3001_v39  ;;  %v1161_v30 = vmul.f32 %v1157_v1, %v3001_v39 }
 0x187   :  { %v1136_v52 = vadd.f32 %v1132_v54, %v1078_v34  ;;  %v1137_v17 = vadd.f32 %v1133_v0, %v1079_v41  ;;  %v1209_v33 = vrot.slane %v1108_v10, %v2249_v36  ;;  %v1213_v48 = vrot.slane %v1109_v15, %v2249_v36  ;;  %v1282_v41 = vpop.permute.xlu0 %1281 }
 0x188   :  { %v2787_v43 = vmul.f32 %v2656_v49, %v1231_v26  ;;  %v2790_v37 = vmul.f32 %v2659_v27, %v1233_v57  ;;  %v1232_v56 = vsel %vm1230_vm7, %v2722_v60, %v1229_v42  ;;  %v1234_v22 = vsel %vm1230_vm7, %v1229_v42, %v2722_v60  ;;  %v2798_v6 = vpop.permute.xlu1 %1337 }
 0x189   :  { %v1164_v25 = vadd.f32 %v1160_v53, %v1136_v52  ;;  %v1165_v50 = vadd.f32 %v1161_v30, %v1137_v17  ;;  %v1188_v38 = vmul.f32 %v1181_v29, %v3002_v5  ;;  %v1189_v8 = vmul.f32 %v1185_v21, %v3002_v5 }
 0x18a   :  { %v1214_v45 = vmul.f32 %v1201_v32, %v3003_v11  ;;  %v1215_v34 = vmul.f32 %v1205_v55, %v3003_v11  ;;  %v1259_v3 = vrot.slane %v2787_v43, %v2227_v28  ;;  %v1263_v59 = vrot.slane %v2790_v37, %v2227_v28 }
 0x18b   :  { %v1192_v60 = vadd.f32 %v1188_v38, %v1164_v25  ;;  %v1193_v9 = vadd.f32 %v1189_v8, %v1165_v50  ;;  %v1250_v42 = vmul.f32 %v2656_v49, %v1232_v56  ;;  %v1251_v44 = vmul.f32 %v2659_v27, %v1234_v22  ;;  %v2825_v16 = vpop.permute.xlu0 %1395 }
 0x18c   :  { %v1216_v2 = vmul.f32 %v1209_v33, %v3003_v11  ;;  %v1217_v39 = vmul.f32 %v1213_v48, %v3003_v11  ;;  %v1218_v7 = vadd.f32 %v1214_v45, %v1190_v46  ;;  %v1219_v14 = vadd.f32 %v1215_v34, %v1191_v35  ;;  %v1365_v5 = vpop.permute.xlu1 %1364 }
 0x18d   :  { %v1287_v13 = vrot.slane %v2787_v43, %v2326_v62  ;;  %v1291_v63 = vrot.slane %v2790_v37, %v2326_v62  ;;  %v1267_v10 = vrot.slane %v1250_v42, %v2227_v28  ;;  %v1271_v49 = vrot.slane %v1251_v44, %v2227_v28 }
 0x18e   :  { %v1272_v27 = vmul.f32 %v1259_v3, %v2640_v18  ;;  %v1273_v15 = vmul.f32 %v1263_v59, %v2640_v18  ;;  %v1295_v4 = vrot.slane %v1250_v42, %v2326_v62  ;;  %v1299_v23 = vrot.slane %v1251_v44, %v2326_v62 }
 0x18f   :  { %v1274_v32 = vmul.f32 %v1267_v10, %v2640_v18  ;;  %v1275_v55 = vmul.f32 %v1271_v49, %v2640_v18  ;;  %v1220_v19 = vadd.f32 %v1216_v2, %v1192_v60  ;;  %v1221_v51 = vadd.f32 %v1217_v39, %v1193_v9  ;;  %v1369_v45 = vpop.permute.xlu0 %1368 }
 0x190   :  { %v1323_v58 = vrot.slane %v1250_v42, %v2236_v31  ;;  %v1327_v1 = vrot.slane %v1251_v44, %v2236_v31  ;;  %v1276_v40 = vadd.f32 %v1272_v27, %v1218_v7  ;;  %v1277_v47 = vadd.f32 %v1273_v15, %v1219_v14  ;;  %v1367_v26 = vpop.permute.xlu1 %1366 }
 0x191   :  { %v1278_v57 = vadd.f32 %v1274_v32, %v1220_v19  ;;  %v1279_v54 = vadd.f32 %v1275_v55, %v1221_v51  ;;  %v1315_v0 = vrot.slane %v2787_v43, %v2236_v31  ;;  %v1319_v29 = vrot.slane %v2790_v37, %v2236_v31 }
 0x192   :  { %v1300_v18 = vmul.f32 %v1287_v13, %v1282_v41  ;;  %v1301_v21 = vmul.f32 %v1291_v63, %v1282_v41  ;;  %v1302_v46 = vmul.f32 %v1295_v4, %v1282_v41  ;;  %v1303_v35 = vmul.f32 %v1299_v23, %v1282_v41 }
 0x193   :  { %v1328_v53 = vmul.f32 %v1315_v0, %v2770_v12  ;;  %v1329_v30 = vmul.f32 %v1319_v29, %v2770_v12  ;;  %v1330_v52 = vmul.f32 %v1323_v58, %v2770_v12  ;;  %v1331_v17 = vmul.f32 %v1327_v1, %v2770_v12  ;;  %v1424_v49 = vpop.permute.xlu0 %1423 }
 0x194   :  { %v1351_v33 = vrot.slane %v1250_v42, %v2249_v36  ;;  %v1355_v48 = vrot.slane %v1251_v44, %v2249_v36  ;;  %v1343_v56 = vrot.slane %v2787_v43, %v2249_v36  ;;  %v1347_v22 = vrot.slane %v2790_v37, %v2249_v36  ;;  %v1371_v25 = vpop.permute.xlu1 %1370 }
 0x195   :  { %v1304_v50 = vadd.f32 %v1300_v18, %v1276_v40  ;;  %v1305_v38 = vadd.f32 %v1301_v21, %v1277_v47  ;;  %v1306_v8 = vadd.f32 %v1302_v46, %v1278_v57  ;;  %v1307_v11 = vadd.f32 %v1303_v35, %v1279_v54 }
 0x196   :  { %v1356_v34 = vmul.f32 %v1343_v56, %v2798_v6  ;;  %v1357_v12 = vmul.f32 %v1347_v22, %v2798_v6  ;;  %v1358_v41 = vmul.f32 %v1351_v33, %v2798_v6  ;;  %v1359_v3 = vmul.f32 %v1355_v48, %v2798_v6 }
 0x197   :  { %v1373_v43 = vsel %vm1372_vm8, %v1365_v5, %v1369_v45  ;;  %v1375_v37 = vsel %vm1372_vm8, %v1369_v45, %v1365_v5  ;;  %v1374_v59 = vsel %vm1372_vm8, %v1367_v26, %v1371_v25  ;;  %v1376_v60 = vsel %vm1372_vm8, %v1371_v25, %v1367_v26 }
 0x198   :  { %v1332_v9 = vadd.f32 %v1328_v53, %v1304_v50  ;;  %v1333_v42 = vadd.f32 %v1329_v30, %v1305_v38  ;;  %v1334_v44 = vadd.f32 %v1330_v52, %v1306_v8  ;;  %v1335_v2 = vadd.f32 %v1331_v17, %v1307_v11  ;;  %v1452_v27 = vpop.permute.xlu1 %1451 }
 0x199   :  { %v1390_v39 = vmul.f32 %v2676_v20, %v1373_v43  ;;  %v1391_v6 = vmul.f32 %v2679_v24, %v1375_v37  ;;  %v1392_v7 = vmul.f32 %v2676_v20, %v1374_v59  ;;  %v1393_v14 = vmul.f32 %v2679_v24, %v1376_v60 }
 0x19a   :  { %v1360_v13 = vadd.f32 %v1356_v34, %v1332_v9  ;;  %v1361_v5 = vadd.f32 %v1357_v12, %v1333_v42  ;;  %v1362_v63 = vadd.f32 %v1358_v41, %v1334_v44  ;;  %v1363_v10 = vadd.f32 %v1359_v3, %v1335_v2  ;;  %v1515_v9 = vpop.permute.xlu0 %1514 }
 0x19b   :  { %v1401_v61 = vrot.slane %v1390_v39, %v2227_v28  ;;  %v1405_v15 = vrot.slane %v1391_v6, %v2227_v28  ;;  %v1429_v4 = vrot.slane %v1390_v39, %v2326_v62  ;;  %v1433_v23 = vrot.slane %v1391_v6, %v2326_v62 }
 0x19c   :  { %v1409_v32 = vrot.slane %v1392_v7, %v2227_v28  ;;  %v1413_v20 = vrot.slane %v1393_v14, %v2227_v28  ;;  %v1437_v24 = vrot.slane %v1392_v7, %v2326_v62  ;;  %v1441_v55 = vrot.slane %v1393_v14, %v2326_v62 }
 0x19d   :  { %v1414_v19 = vmul.f32 %v1401_v61, %v2825_v16  ;;  %v1415_v51 = vmul.f32 %v1405_v15, %v2825_v16  ;;  %v1442_v58 = vmul.f32 %v1429_v4, %v1424_v49  ;;  %v1443_v1 = vmul.f32 %v1433_v23, %v1424_v49  ;;  %v1480_v30 = vpop.permute.xlu1 %1479 }
 0x19e   :  { %v1416_v40 = vmul.f32 %v1409_v32, %v2825_v16  ;;  %v1417_v47 = vmul.f32 %v1413_v20, %v2825_v16  ;;  %v1465_v26 = vrot.slane %v1392_v7, %v2236_v31  ;;  %v1469_v57 = vrot.slane %v1393_v14, %v2236_v31  ;;  %v1576_v61 = vpop.permute.xlu0 %1575 }
 0x19f   :  { %v1418_v54 = vadd.f32 %v1414_v19, %v1360_v13  ;;  %v1419_v0 = vadd.f32 %v1415_v51, %v1361_v5  ;;  %v1444_v29 = vmul.f32 %v1437_v24, %v1424_v49  ;;  %v1445_v18 = vmul.f32 %v1441_v55, %v1424_v49 }
 0x1a0   :  { %v1420_v21 = vadd.f32 %v1416_v40, %v1362_v63  ;;  %v1421_v46 = vadd.f32 %v1417_v47, %v1363_v10  ;;  %v1457_v35 = vrot.slane %v1390_v39, %v2236_v31  ;;  %v1461_v53 = vrot.slane %v1391_v6, %v2236_v31 }
 0x1a1   :  { %v1446_v52 = vadd.f32 %v1442_v58, %v1418_v54  ;;  %v1447_v17 = vadd.f32 %v1443_v1, %v1419_v0  ;;  %v1472_v33 = vmul.f32 %v1465_v26, %v1452_v27  ;;  %v1473_v48 = vmul.f32 %v1469_v57, %v1452_v27 }
 0x1a2   :  { %v1448_v16 = vadd.f32 %v1444_v29, %v1420_v21  ;;  %v1449_v56 = vadd.f32 %v1445_v18, %v1421_v46  ;;  %v1470_v22 = vmul.f32 %v1457_v35, %v1452_v27  ;;  %v1471_v25 = vmul.f32 %v1461_v53, %v1452_v27  ;;  %v1540_v3 = vpop.permute.xlu1 %1539 }
 0x1a3   :  { %v1493_v50 = vrot.slane %v1392_v7, %v2249_v36  ;;  %v1497_v38 = vrot.slane %v1393_v14, %v2249_v36  ;;  %v1485_v8 = vrot.slane %v1390_v39, %v2249_v36  ;;  %v1489_v11 = vrot.slane %v1391_v6, %v2249_v36 }
 0x1a4   :  { %v1474_v45 = vadd.f32 %v1470_v22, %v1446_v52  ;;  %v1475_v34 = vadd.f32 %v1471_v25, %v1447_v17  ;;  %v1476_v12 = vadd.f32 %v1472_v33, %v1448_v16  ;;  %v1477_v41 = vadd.f32 %v1473_v48, %v1449_v56 }
 0x1a5   :  { %v1498_v43 = vmul.f32 %v1485_v8, %v1480_v30  ;;  %v1499_v37 = vmul.f32 %v1489_v11, %v1480_v30  ;;  %v1500_v59 = vmul.f32 %v1493_v50, %v1480_v30  ;;  %v1501_v60 = vmul.f32 %v1497_v38, %v1480_v30 }
 0x1a7   :  { %v1502_v42 = vadd.f32 %v1498_v43, %v1474_v45  ;;  %v1503_v44 = vadd.f32 %v1499_v37, %v1475_v34  ;;  %v1504_v2 = vadd.f32 %v1500_v59, %v1476_v12  ;;  %v1505_v7 = vadd.f32 %v1501_v60, %v1477_v41  ;;  %v1548_v63 = vpop.permute.xlu1 %1547 }
 0x1a9   :  { %v1506_v13 = vmax.f32 %v1502_v42, 0.0  ;;  %v1507_v14 = vmax.f32 %v1503_v44, 0.0  ;;  %v1508_v5 = vmax.f32 %v1504_v2, 0.0  ;;  %v1509_v39 = vmax.f32 %v1505_v7, 0.0 }
 0x1ab   :  { %v1520_v6 = vrot.slane %v1506_v13, %v2227_v28  ;;  %v1528_v10 = vrot.slane %v1508_v5, %v2227_v28  ;;  %v1532_v49 = vrot.slane %v1509_v39, %v2227_v28  ;;  %v1524_v27 = vrot.slane %v1507_v14, %v2227_v28 }
 0x1ac   :  { %v1581_v15 = vrot.slane %v1506_v13, %v2236_v31  ;;  %v1589_v4 = vrot.slane %v1508_v5, %v2236_v31  ;;  %v1593_v23 = vrot.slane %v1509_v39, %v2236_v31  ;;  %v1585_v32 = vrot.slane %v1507_v14, %v2236_v31  ;;  %v1604_v21 = vpop.permute.xlu1 %1603 }
 0x1ad   :  { %v1533_v20 = vmul.f32 %v1520_v6, %v1515_v9  ;;  %v1534_v24 = vmul.f32 %v1524_v27, %v1515_v9  ;;  %v1535_v55 = vmul.f32 %v1528_v10, %v1515_v9  ;;  %v1536_v19 = vmul.f32 %v1532_v49, %v1515_v9 }
 0x1ae   :  { %v1594_v51 = vmul.f32 %v1581_v15, %v1576_v61  ;;  %v1595_v58 = vmul.f32 %v1585_v32, %v1576_v61  ;;  %v1596_v1 = vmul.f32 %v1589_v4, %v1576_v61  ;;  %v1597_v40 = vmul.f32 %v1593_v23, %v1576_v61 }
 0x1af   :  { %v1542_v47 = vadd.f32 %v1540_v3, %v1533_v20  ;;  %v1543_v26 = vadd.f32 %v1540_v3, %v1534_v24  ;;  %v1544_v57 = vadd.f32 %v1540_v3, %v1535_v55  ;;  %v1545_v54 = vadd.f32 %v1540_v3, %v1536_v19 }
 0x1b0   :  { %v1553_v0 = vrot.slane %v1506_v13, %v2326_v62  ;;  %v1557_v29 = vrot.slane %v1507_v14, %v2326_v62  ;;  %v1561_v18 = vrot.slane %v1508_v5, %v2326_v62  ;;  %v1565_v31 = vrot.slane %v1509_v39, %v2326_v62 }
 0x1b1   :  { %v1609_v46 = vrot.slane %v1506_v13, %v2249_v36  ;;  %v1613_v35 = vrot.slane %v1507_v14, %v2249_v36  ;;  %v1617_v53 = vrot.slane %v1508_v5, %v2249_v36  ;;  %v1621_v30 = vrot.slane %v1509_v39, %v2249_v36 }
 0x1b2   :  { %v1566_v52 = vmul.f32 %v1553_v0, %v1548_v63  ;;  %v1567_v17 = vmul.f32 %v1557_v29, %v1548_v63  ;;  %v1568_v33 = vmul.f32 %v1561_v18, %v1548_v63  ;;  %v1569_v48 = vmul.f32 %v1565_v31, %v1548_v63  ;;  %v1859_v29 = vld [vmem:[#allocation5] sm:$0xff] }
 0x1b3   :  { %v1622_v16 = vmul.f32 %v1609_v46, %v1604_v21  ;;  %v1623_v56 = vmul.f32 %v1613_v35, %v1604_v21  ;;  %v1624_v22 = vmul.f32 %v1617_v53, %v1604_v21  ;;  %v1625_v25 = vmul.f32 %v1621_v30, %v1604_v21 }
 0x1b4   :  { %v1570_v50 = vadd.f32 %v1566_v52, %v1542_v47  ;;  %v1571_v38 = vadd.f32 %v1567_v17, %v1543_v26  ;;  %v1572_v8 = vadd.f32 %v1568_v33, %v1544_v57  ;;  %v1573_v11 = vadd.f32 %v1569_v48, %v1545_v54  ;;  %v1858_v57 = vld [vmem:[%s2947_s1] sm:$0xff] }
 0x1b6   :  { %v1598_v45 = vadd.f32 %v1594_v51, %v1570_v50  ;;  %v1599_v34 = vadd.f32 %v1595_v58, %v1571_v38  ;;  %v1600_v12 = vadd.f32 %v1596_v1, %v1572_v8  ;;  %v1601_v41 = vadd.f32 %v1597_v40, %v1573_v11 }
 0x1b8   :  { %v1626_v3 = vadd.f32 %v1622_v16, %v1598_v45  ;;  %v1627_v43 = vadd.f32 %v1623_v56, %v1599_v34  ;;  %v1628_v37 = vadd.f32 %v1624_v22, %v1600_v12  ;;  %v1629_v36 = vadd.f32 %v1625_v25, %v1601_v41 }
 0x1ba   :  { %v1630_v59 = vsub.f32 0.0, %v1626_v3  ;;  %v1631_v60 = vsub.f32 0.0, %v1627_v43  ;;  %v1632_v9 = vsub.f32 0.0, %v1628_v37  ;;  %v1633_v42 = vsub.f32 0.0, %v1629_v36 }
 0x1bc   :  { %v1634_v44 = vmul.f32 1.442695, %v1630_v59  ;;  %v1636_v2 = vmul.f32 1.442695, %v1631_v60  ;;  %v1638_v7 = vmul.f32 1.442695, %v1632_v9 }
 0x1bd   :  { %v1640_v13 = vmul.f32 1.442695, %v1633_v42 }
 0x1be   :  { %1842 = vpow2.f32 %v1634_v44 }
 0x1bf   :  { %1844 = vpow2.f32 %v1636_v2 }
 0x1c0   :  { %1846 = vpow2.f32 %v1638_v7 }
 0x1c1   :  { %1848 = vpow2.f32 %v1640_v13 }
 0x1c8   :  { %v1843_v14 = vpop.eup %1842 }
 0x1c9   :  { %v1845_v5 = vpop.eup %1844  ;;  %v1642_v39 = vadd.f32 1.0, %v1843_v14 }
 0x1ca   :  { %v1847_v63 = vpop.eup %1846  ;;  %v1643_v6 = vadd.f32 1.0, %v1845_v5 }
 0x1cb   :  { %v1849_v10 = vpop.eup %1848  ;;  %v1644_v49 = vadd.f32 1.0, %v1847_v63  ;;  %1850 = vrcp.f32 %v1642_v39 }
 0x1cc   :  { %v1645_v27 = vadd.f32 1.0, %v1849_v10  ;;  %1852 = vrcp.f32 %v1643_v6 }
 0x1cd   :  { %1854 = vrcp.f32 %v1644_v49 }
 0x1ce   :  { %1856 = vrcp.f32 %v1645_v27 }
 0x1d5   :  { %v1851_v61 = vpop.eup %1850 }
 0x1d6   :  { %v1853_v15 = vpop.eup %1852  ;;  %v1653_v4 = vrot.slane %v1851_v61, %v2227_v28  ;;  %v1681_v23 = vrot.slane %v1851_v61, %v2326_v62 }
 0x1d7   :  { %v1855_v32 = vpop.eup %1854  ;;  %v1657_v20 = vrot.slane %v1853_v15, %v2227_v28  ;;  %v1685_v24 = vrot.slane %v1853_v15, %v2326_v62 }
 0x1d8   :  { %v1857_v55 = vpop.eup %1856  ;;  %v1661_v19 = vrot.slane %v1855_v32, %v2227_v28  ;;  %v1689_v51 = vrot.slane %v1855_v32, %v2326_v62 }
 0x1d9   :  { %v1665_v58 = vrot.slane %v1857_v55, %v2227_v28  ;;  %v1670_v1 = vcombine.low %v1653_v4, %v1657_v20  ;;  %v1693_v40 = vrot.slane %v1857_v55, %v2326_v62  ;;  %v1698_v47 = vcombine.low %v1681_v23, %v1685_v24  ;;  %v1860_v28 = vld [vmem:[%s2947_s1 + $0x8] sm:$0xff] }
 0x1da   :  { %v1861_v62 = vld [vmem:[#allocation5 + $0x8] sm:$0xff] }
 0x1db   :  { %v1671_v26 = vcombine.low %v1661_v19, %v1665_v58  ;;  %v1674_v54 = vmul.f32 %v1858_v57, %v1670_v1  ;;  %v1699_v0 = vcombine.low %v1689_v51, %v1693_v40  ;;  %v1702_v18 = vmul.f32 %v1859_v29, %v1698_v47 }
 0x1dd   :  { %v1675_v31 = vmul.f32 %v1860_v28, %v1671_v26  ;;  %1676 = vst [vmem:[#allocation7] sm:$0xff] %v1674_v54  ;;  %v1703_v21 = vmul.f32 %v1861_v62, %v1699_v0  ;;  %1704 = vst [vmem:[#allocation8] sm:$0xff] %v1702_v18 }
 0x1df   :  { %1677 = vst [vmem:[#allocation7 + $0x8] sm:$0xff] %v1675_v31  ;;  %1705 = vst [vmem:[#allocation8 + $0x8] sm:$0xff] %v1703_v21 }
 0x1e0   :  { %1917 = shalt.err (!%p1914_p6)
}
 0x1e1   :  { %s1918_s1 = scalar_lea.hbm %s2955_s9, 256 }
 0x1e2   :  { %p1919_p7 = scmp.ne.s32.totalorder %s2955_s9, %s1918_s1  ;;  %p1922_p8 = scmp.lt.u32.totalorder %s1918_s1, %s2955_s9 }
 0x1e4   :  { %p1924_p9 = pnand %p1922_p8, %p1919_p7 }
 0x1e6   :  { %1927 = shalt.err (!%p1924_p9)
}
 0x1e7   :  { %1717 = dma.vmem_to_hbm [thread:$0]  %s1712_s18, 256, %s2955_s9, [#allocation4], %s1962_s0, %s1962_s0, %s1963_s14  }
 0x1e8   :  { %s1928_s30 = scalar_lea.vmem %s2909_s2, 256  ;;  %p1933_p11 = scmp.lt.s32.totalorder %s2909_s2, %s2909_s2 }
 0x1e9   :  { %p1929_p10 = scmp.ne.s32.totalorder %s2909_s2, %s1928_s30  ;;  %p1934_p12 = scmp.lt.s32.totalorder %s1928_s30, %s1928_s30 }
 0x1eb   :  { %p1935_p13 = por %p1934_p12, %p1933_p11 }
 0x1ed   :  { %p1936_p0 = pnand %p1935_p13, %p1929_p10 }
 0x1ef   :  { %1939 = shalt.err (!%p1936_p0)
}
 0x1f0   :  { %s1940_s12 = scalar_lea.hbm %s2956_s10, 256 }
 0x1f1   :  { %p1941_p1 = scmp.ne.s32.totalorder %s2956_s10, %s1940_s12  ;;  %p1944_p2 = scmp.lt.u32.totalorder %s1940_s12, %s2956_s10 }
 0x1f3   :  { %p1946_p3 = pnand %p1944_p2, %p1941_p1 }
 0x1f5   :  { %1949 = shalt.err (!%p1946_p3)
}
 0x1f6   :  { %1729 = dma.vmem_to_hbm [thread:$0]  %s2909_s2, 256, %s2956_s10, [#allocation9], %s1962_s0, %s1962_s0, %s1963_s14  }
 0x1f7   :  { %1954 = dma.done.wait [#allocation4], 256  }
 0x1f8   :  { %1955 = vsyncadd [#allocation4], 4294967040 }
 0x1f9   :  { %1956 = dma.done.wait [#allocation9], 256  }
 0x1fa   :  { %1957 = vsyncadd [#allocation9], 4294967040 }
 0x1fb   :  { %1736 = vsyncpa [#allocation3], 1 }
 0x1fc   :  { %1737 = vsyncpa [#allocation6], 1 }
 0x1fd   :  { %1738 = vsyncpa [#allocation4], 1 }
 0x1fe   :  { %1739 = vsyncpa [#allocation9], 1 }

</bundles_post_ra>
